<compile_context>
chip_gen: v7x
topology: tpu7x:2x2x1
jax: 0.10.0
libtpu: 0.0.40
codegen_flags: <defaults>
</compile_context>

<pallas_src>
import functools

import jax
import jax.numpy as jnp
from jax.experimental import pallas as pl
from jax.experimental.pallas import tpu as pltpu


# ------------------------------ fused kernel ------------------------------

def _bert_encoder_kernel(x_emb_ref, emb_g_ref, emb_b_ref, mask_ref,
                         wqkv_ref, bqkv_ref, wo_ref, bo_ref,
                         ln1_g_ref, ln1_b_ref, w1_ref, b1_ref,
                         w2_ref, b2_ref, ln2_g_ref, ln2_b_ref,
                         pool_w_ref, pool_b_ref, cls_w_ref, cls_b_ref,
                         logits_ref, h_ref,
                         *, num_layers, B, S, H, nH, dH, eps, scale):
    l = pl.program_id(0)

    def layernorm(x, g, b):
        mu = jnp.mean(x, axis=-1, keepdims=True)
        var = jnp.mean((x - mu) ** 2, axis=-1, keepdims=True)
        return (x - mu) * jax.lax.rsqrt(var + eps) * g + b

    # Step 0: embedding LayerNorm into the resident activation scratch.
    @pl.when(l == 0)
    def _():
        h_ref[...] = layernorm(x_emb_ref[...], emb_g_ref[...], emb_b_ref[...])

    h = h_ref[...]                                     # (B*S, H), VMEM-resident

    # ---- fused QKV projection: one (H, 3H) matmul ----
    qkv = jnp.dot(h, wqkv_ref[0],
                  preferred_element_type=jnp.float32) + bqkv_ref[0]  # (B*S, 3H)

    # ---- multi-head self-attention (static unroll over batch & heads) ----
    mask_add = mask_ref[...]                           # (B, S) additive mask
    ctx_rows = []
    for b in range(B):
        r0, r1 = b * S, (b + 1) * S
        madd = mask_add[b:b + 1, :]                    # (1, S), broadcast over rows
        heads = []
        for hh in range(nH):
            q = qkv[r0:r1, hh * dH:(hh + 1) * dH]              # (S, dH)
            k = qkv[r0:r1, H + hh * dH:H + (hh + 1) * dH]      # (S, dH)
            v = qkv[r0:r1, 2 * H + hh * dH:2 * H + (hh + 1) * dH]
            s = jax.lax.dot_general(q, k, (((1,), (1,)), ((), ())),
                                    preferred_element_type=jnp.float32) * scale
            s = s + madd
            s = s - jnp.max(s, axis=-1, keepdims=True)
            p = jnp.exp(s)
            p = p * pl.reciprocal(jnp.sum(p, axis=-1, keepdims=True), approx=True)
            heads.append(jnp.dot(p, v, preferred_element_type=jnp.float32))
        ctx_rows.append(jnp.concatenate(heads, axis=-1))        # (S, H)
    ctx = jnp.concatenate(ctx_rows, axis=0)                     # (B*S, H)

    # ---- attention output projection + Add&LN ----
    attn_out = jnp.dot(ctx, wo_ref[0],
                       preferred_element_type=jnp.float32) + bo_ref[0]
    h1 = layernorm(attn_out + h, ln1_g_ref[0], ln1_b_ref[0])

    # ---- FFN + Add&LN ----
    mid = jnp.dot(h1, w1_ref[0], preferred_element_type=jnp.float32) + b1_ref[0]
    # TODO(synk): HF BERT default is exact erf-GELU; tanh approximation differs ~1e-3.
    mid = 0.5 * mid * (1.0 + jnp.tanh(0.7978845608028654 *
                                      (mid + 0.044715 * mid * mid * mid)))
    ffn_out = jnp.dot(mid, w2_ref[0],
                      preferred_element_type=jnp.float32) + b2_ref[0]
    h2 = layernorm(ffn_out + h1, ln2_g_ref[0], ln2_b_ref[0])

    h_ref[...] = h2                                    # carry to next layer

    # ---- last layer: pooler (tanh on CLS) + classifier, dropout == identity ----
    @pl.when(l == num_layers - 1)
    def _():
        cls = jnp.concatenate([h2[b * S:b * S + 1, :] for b in range(B)], axis=0)
        pooled = jnp.tanh(jnp.dot(cls, pool_w_ref[...],
                                  preferred_element_type=jnp.float32)
                          + pool_b_ref[...])
        logits_ref[...] = (jnp.dot(pooled, cls_w_ref[...],
                                   preferred_element_type=jnp.float32)
                           + cls_b_ref[...])


# ------------------------------- BERT model -------------------------------

CFG = dict(
    vocab_size=64,
    type_vocab_size=2,
    max_position=16,
    hidden_size=32,
    num_heads=2,
    intermediate_size=64,
    num_layers=2,
    num_labels=3,
)


def init_params(key, cfg):
    H = cfg["hidden_size"]
    I = cfg["intermediate_size"]
    L = cfg["num_layers"]
    NL = cfg["num_labels"]

    def nrm(k, shape):
        return 0.02 * jax.random.normal(k, shape, jnp.float32)

    keys = iter(jax.random.split(key, 16))
    return {
        "word_emb": nrm(next(keys), (cfg["vocab_size"], H)),
        "pos_emb": nrm(next(keys), (cfg["max_position"], H)),
        "type_emb": nrm(next(keys), (cfg["type_vocab_size"], H)),
        "emb_ln_g": jnp.ones((1, H), jnp.float32),
        "emb_ln_b": jnp.zeros((1, H), jnp.float32),
        # per-layer weights stacked on a leading [num_layers] axis
        "wqkv": nrm(next(keys), (L, H, 3 * H)),       # merged Wq|Wk|Wv
        "bqkv": jnp.zeros((L, 1, 3 * H), jnp.float32),
        "wo": nrm(next(keys), (L, H, H)),
        "bo": jnp.zeros((L, 1, H), jnp.float32),
        "ln1_g": jnp.ones((L, 1, H), jnp.float32),
        "ln1_b": jnp.zeros((L, 1, H), jnp.float32),
        "w1": nrm(next(keys), (L, H, I)),
        "b1": jnp.zeros((L, 1, I), jnp.float32),
        "w2": nrm(next(keys), (L, I, H)),
        "b2": jnp.zeros((L, 1, H), jnp.float32),
        "ln2_g": jnp.ones((L, 1, H), jnp.float32),
        "ln2_b": jnp.zeros((L, 1, H), jnp.float32),
        "pool_w": nrm(next(keys), (H, H)),
        "pool_b": jnp.zeros((1, H), jnp.float32),
        "cls_w": nrm(next(keys), (H, NL)),
        "cls_b": jnp.zeros((1, NL), jnp.float32),
    }


def bert_forward(params, input_ids, attention_mask, token_type_ids, cfg):
    B, S = input_ids.shape
    H = cfg["hidden_size"]
    nH = cfg["num_heads"]
    dH = H // nH
    I = cfg["intermediate_size"]
    L = cfg["num_layers"]
    NL = cfg["num_labels"]
    scale = 1.0 / (dH ** 0.5)

    # ---- embeddings: table gathers kept in plain JAX ----
    positions = jnp.arange(S, dtype=jnp.int32)
    emb = (jnp.take(params["word_emb"], input_ids, axis=0)
           + jnp.take(params["pos_emb"], positions, axis=0)[None, :, :]
           + jnp.take(params["type_emb"], token_type_ids, axis=0))
    x_emb = emb.reshape(B * S, H)

    # additive attention mask, precomputed once (0 keep, -1e9 masked)
    mask_add = (1.0 - attention_mask.astype(jnp.float32)) * (-1e9)   # (B, S)

    kern = functools.partial(_bert_encoder_kernel, num_layers=L, B=B, S=S,
                             H=H, nH=nH, dH=dH, eps=1e-12, scale=scale)

    rep2 = lambda l: (0, 0)        # replicated across layer steps
    lyr3 = lambda l: (l, 0, 0)     # per-layer stacked weights

    logits = pl.pallas_call(
        kern,
        out_shape=jax.ShapeDtypeStruct((B, NL), jnp.float32),
        grid=(L,),
        in_specs=[
            pl.BlockSpec((B * S, H), rep2),      # x_emb
            pl.BlockSpec((1, H), rep2),          # emb_ln_g
            pl.BlockSpec((1, H), rep2),          # emb_ln_b
            pl.BlockSpec((B, S), rep2),          # mask_add
            pl.BlockSpec((1, H, 3 * H), lyr3),   # wqkv
            pl.BlockSpec((1, 1, 3 * H), lyr3),   # bqkv
            pl.BlockSpec((1, H, H), lyr3),       # wo
            pl.BlockSpec((1, 1, H), lyr3),       # bo
            pl.BlockSpec((1, 1, H), lyr3),       # ln1_g
            pl.BlockSpec((1, 1, H), lyr3),       # ln1_b
            pl.BlockSpec((1, H, I), lyr3),       # w1
            pl.BlockSpec((1, 1, I), lyr3),       # b1
            pl.BlockSpec((1, I, H), lyr3),       # w2
            pl.BlockSpec((1, 1, H), lyr3),       # b2
            pl.BlockSpec((1, 1, H), lyr3),       # ln2_g
            pl.BlockSpec((1, 1, H), lyr3),       # ln2_b
            pl.BlockSpec((H, H), rep2),          # pool_w
            pl.BlockSpec((1, H), rep2),          # pool_b
            pl.BlockSpec((H, NL), rep2),         # cls_w
            pl.BlockSpec((1, NL), rep2),         # cls_b
        ],
        out_specs=pl.BlockSpec((B, NL), rep2),
        scratch_shapes=[pltpu.VMEM((B * S, H), jnp.float32)],   # resident activation
        compiler_params=pltpu.CompilerParams(
            dimension_semantics=("arbitrary",)),
    )(x_emb, params["emb_ln_g"], params["emb_ln_b"], mask_add,
      params["wqkv"], params["bqkv"], params["wo"], params["bo"],
      params["ln1_g"], params["ln1_b"], params["w1"], params["b1"],
      params["w2"], params["b2"], params["ln2_g"], params["ln2_b"],
      params["pool_w"], params["pool_b"], params["cls_w"], params["cls_b"])

    return logits


# --------------------------------- main ---------------------------------

if __name__ == "__main__":
    cfg = CFG
    B, S = 2, 8
    key = jax.random.PRNGKey(0)
    kp, kids = jax.random.split(key, 2)

    params = init_params(kp, cfg)
    input_ids = jax.random.randint(kids, (B, S), 0, cfg["vocab_size"], jnp.int32)
    attention_mask = jnp.ones((B, S), jnp.int32).at[1, 6:].set(0)   # ragged mask
    token_type_ids = jnp.zeros((B, S), jnp.int32).at[:, S // 2:].set(1)

    fwd = jax.jit(functools.partial(bert_forward, cfg=cfg))
    logits = fwd(params, input_ids, attention_mask, token_type_ids)
    jax.block_until_ready(logits)
    assert logits.shape == (B, cfg["num_labels"])
    assert bool(jnp.all(jnp.isfinite(logits)))
    print("KERNEL_OK")
</pallas_src>

<mosaic_0001>
module attributes {stable_mosaic.version = 11 : i64} {
  func.func @_bert_encoder_kernel(%arg0: i32, %arg1: memref<16x32xf32, #tpu.memory_space<vmem>>, %arg2: memref<1x32xf32, #tpu.memory_space<vmem>>, %arg3: memref<1x32xf32, #tpu.memory_space<vmem>>, %arg4: memref<2x8xf32, #tpu.memory_space<vmem>>, %arg5: memref<1x32x96xf32, #tpu.memory_space<vmem>>, %arg6: memref<1x1x96xf32, #tpu.memory_space<vmem>>, %arg7: memref<1x32x32xf32, #tpu.memory_space<vmem>>, %arg8: memref<1x1x32xf32, #tpu.memory_space<vmem>>, %arg9: memref<1x1x32xf32, #tpu.memory_space<vmem>>, %arg10: memref<1x1x32xf32, #tpu.memory_space<vmem>>, %arg11: memref<1x32x64xf32, #tpu.memory_space<vmem>>, %arg12: memref<1x1x64xf32, #tpu.memory_space<vmem>>, %arg13: memref<1x64x32xf32, #tpu.memory_space<vmem>>, %arg14: memref<1x1x32xf32, #tpu.memory_space<vmem>>, %arg15: memref<1x1x32xf32, #tpu.memory_space<vmem>>, %arg16: memref<1x1x32xf32, #tpu.memory_space<vmem>>, %arg17: memref<32x32xf32, #tpu.memory_space<vmem>>, %arg18: memref<1x32xf32, #tpu.memory_space<vmem>>, %arg19: memref<32x3xf32, #tpu.memory_space<vmem>>, %arg20: memref<1x3xf32, #tpu.memory_space<vmem>>, %arg21: memref<2x3xf32, #tpu.memory_space<vmem>>, %arg22: memref<16x32xf32, #tpu.memory_space<vmem>>) attributes {dimension_semantics = [#tpu.dimension_semantics<arbitrary>], iteration_bounds = array<i64: 2>, scalar_prefetch = 0 : i64, scratch_operands = 1 : i64, tpu.core_type = #tpu.core_type<tc>, window_params = [{pipeline_mode = #tpu.pipeline_mode<synchronous>, transform_indices = @transform_0, window_bounds = array<i64: 16, 32>}, {pipeline_mode = #tpu.pipeline_mode<synchronous>, transform_indices = @transform_1, window_bounds = array<i64: 1, 32>}, {pipeline_mode = #tpu.pipeline_mode<synchronous>, transform_indices = @transform_2, window_bounds = array<i64: 1, 32>}, {pipeline_mode = #tpu.pipeline_mode<synchronous>, transform_indices = @transform_3, window_bounds = array<i64: 2, 8>}, {transform_indices = @transform_4, window_bounds = array<i64: 1, 32, 96>}, {transform_indices = @transform_5, window_bounds = array<i64: 1, 1, 96>}, {transform_indices = @transform_6, window_bounds = array<i64: 1, 32, 32>}, {transform_indices = @transform_7, window_bounds = array<i64: 1, 1, 32>}, {transform_indices = @transform_8, window_bounds = array<i64: 1, 1, 32>}, {transform_indices = @transform_9, window_bounds = array<i64: 1, 1, 32>}, {transform_indices = @transform_10, window_bounds = array<i64: 1, 32, 64>}, {transform_indices = @transform_11, window_bounds = array<i64: 1, 1, 64>}, {transform_indices = @transform_12, window_bounds = array<i64: 1, 64, 32>}, {transform_indices = @transform_13, window_bounds = array<i64: 1, 1, 32>}, {transform_indices = @transform_14, window_bounds = array<i64: 1, 1, 32>}, {transform_indices = @transform_15, window_bounds = array<i64: 1, 1, 32>}, {pipeline_mode = #tpu.pipeline_mode<synchronous>, transform_indices = @transform_16, window_bounds = array<i64: 32, 32>}, {pipeline_mode = #tpu.pipeline_mode<synchronous>, transform_indices = @transform_17, window_bounds = array<i64: 1, 32>}, {pipeline_mode = #tpu.pipeline_mode<synchronous>, transform_indices = @transform_18, window_bounds = array<i64: 32, 3>}, {pipeline_mode = #tpu.pipeline_mode<synchronous>, transform_indices = @transform_19, window_bounds = array<i64: 1, 3>}, {pipeline_mode = #tpu.pipeline_mode<synchronous>, transform_indices = @transform_20, window_bounds = array<i64: 2, 3>}]} {
    %c0_i32 = arith.constant 0 : i32
    %0 = arith.cmpi eq, %arg0, %c0_i32 : i32
    %1 = arith.extui %0 : i1 to i32
    %c0_i32_0 = arith.constant 0 : i32
    %2 = arith.cmpi ne, %1, %c0_i32_0 : i32
    scf.if %2 {
      %c0_80 = arith.constant 0 : index
      %c0_81 = arith.constant 0 : index
      %185 = vector.load %arg1[%c0_80, %c0_81] : memref<16x32xf32, #tpu.memory_space<vmem>>, vector<16x32xf32>
      %c0_82 = arith.constant 0 : index
      %c0_83 = arith.constant 0 : index
      %186 = vector.load %arg2[%c0_82, %c0_83] : memref<1x32xf32, #tpu.memory_space<vmem>>, vector<1x32xf32>
      %c0_84 = arith.constant 0 : index
      %c0_85 = arith.constant 0 : index
      %187 = vector.load %arg3[%c0_84, %c0_85] : memref<1x32xf32, #tpu.memory_space<vmem>>, vector<1x32xf32>
      %cst_86 = arith.constant dense<0.000000e+00> : vector<16xf32>
      %188 = vector.multi_reduction <add>, %185, %cst_86 [1] : vector<16x32xf32> to vector<16xf32>
      %189 = vector.shape_cast %188 : vector<16xf32> to vector<16x1xf32>
      %cst_87 = arith.constant 3.200000e+01 : f32
      %190 = vector.broadcast %cst_87 : f32 to vector<16x1xf32>
      %191 = arith.divf %189, %190 : vector<16x1xf32>
      %192 = vector.broadcast %191 : vector<16x1xf32> to vector<16x32xf32>
      %193 = arith.subf %185, %192 : vector<16x32xf32>
      %194 = arith.mulf %193, %193 : vector<16x32xf32>
      %cst_88 = arith.constant dense<0.000000e+00> : vector<16xf32>
      %195 = vector.multi_reduction <add>, %194, %cst_88 [1] : vector<16x32xf32> to vector<16xf32>
      %196 = vector.shape_cast %195 : vector<16xf32> to vector<16x1xf32>
      %cst_89 = arith.constant 3.200000e+01 : f32
      %197 = vector.broadcast %cst_89 : f32 to vector<16x1xf32>
      %198 = arith.divf %196, %197 : vector<16x1xf32>
      %199 = vector.broadcast %191 : vector<16x1xf32> to vector<16x32xf32>
      %200 = arith.subf %185, %199 : vector<16x32xf32>
      %cst_90 = arith.constant 9.99999996E-13 : f32
      %201 = vector.broadcast %cst_90 : f32 to vector<16x1xf32>
      %202 = arith.addf %198, %201 : vector<16x1xf32>
      %203 = math.rsqrt %202 : vector<16x1xf32>
      %204 = vector.broadcast %203 : vector<16x1xf32> to vector<16x32xf32>
      %205 = arith.mulf %200, %204 : vector<16x32xf32>
      %206 = vector.broadcast %186 : vector<1x32xf32> to vector<16x32xf32>
      %207 = arith.mulf %205, %206 : vector<16x32xf32>
      %208 = vector.broadcast %187 : vector<1x32xf32> to vector<16x32xf32>
      %209 = arith.addf %207, %208 : vector<16x32xf32>
      %c0_91 = arith.constant 0 : index
      %c0_92 = arith.constant 0 : index
      %210 = vector.load %arg22[%c0_91, %c0_92] : memref<16x32xf32, #tpu.memory_space<vmem>>, vector<16x32xf32>
      tpu.vector_store %arg22[%c0_91, %c0_92], %209 {strides = array<i32>} : memref<16x32xf32, #tpu.memory_space<vmem>>, vector<16x32xf32>,
    } else {
    }
    %c0 = arith.constant 0 : index
    %c0_1 = arith.constant 0 : index
    %3 = vector.load %arg22[%c0, %c0_1] : memref<16x32xf32, #tpu.memory_space<vmem>>, vector<16x32xf32>
    %c0_2 = arith.constant 0 : index
    %c0_3 = arith.constant 0 : index
    %c0_4 = arith.constant 0 : index
    %4 = vector.load %arg5[%c0_2, %c0_3, %c0_4] : memref<1x32x96xf32, #tpu.memory_space<vmem>>, vector<1x32x96xf32>
    %5 = vector.shape_cast %4 : vector<1x32x96xf32> to vector<32x96xf32>
    %cst = arith.constant dense<0.000000e+00> : vector<16x96xf32>
    %6 = tpu.matmul %3, %5, %cst {dimension_numbers = #tpu.dot_dimension_numbers<[1], [0], [0], [1], [0, 0, 1, 1], [], []>} : vector<16x32xf32>, vector<32x96xf32>, vector<16x96xf32> -> vector<16x96xf32>
    %c0_5 = arith.constant 0 : index
    %c0_6 = arith.constant 0 : index
    %c0_7 = arith.constant 0 : index
    %7 = vector.load %arg6[%c0_5, %c0_6, %c0_7] : memref<1x1x96xf32, #tpu.memory_space<vmem>>, vector<1x1x96xf32>
    %8 = vector.shape_cast %7 : vector<1x1x96xf32> to vector<1x96xf32>
    %9 = vector.broadcast %8 : vector<1x96xf32> to vector<16x96xf32>
    %10 = arith.addf %6, %9 : vector<16x96xf32>
    %c0_8 = arith.constant 0 : index
    %c0_9 = arith.constant 0 : index
    %11 = vector.load %arg4[%c0_8, %c0_9] : memref<2x8xf32, #tpu.memory_space<vmem>>, vector<2x8xf32>
    %12 = vector.extract_strided_slice %11 {offsets = [0, 0], sizes = [1, 8], strides = [1, 1]} : vector<2x8xf32> to vector<1x8xf32>
    %13 = vector.extract_strided_slice %10 {offsets = [0, 0], sizes = [8, 16], strides = [1, 1]} : vector<16x96xf32> to vector<8x16xf32>
    %14 = vector.extract_strided_slice %10 {offsets = [0, 32], sizes = [8, 16], strides = [1, 1]} : vector<16x96xf32> to vector<8x16xf32>
    %15 = vector.extract_strided_slice %10 {offsets = [0, 64], sizes = [8, 16], strides = [1, 1]} : vector<16x96xf32> to vector<8x16xf32>
    %cst_10 = arith.constant dense<0.000000e+00> : vector<8x8xf32>
    %16 = tpu.matmul %13, %14, %cst_10 {dimension_numbers = #tpu.dot_dimension_numbers<[1], [1], [0], [0], [0, 0, 1, 0], [], []>} : vector<8x16xf32>, vector<8x16xf32>, vector<8x8xf32> -> vector<8x8xf32>
    %cst_11 = arith.constant 2.500000e-01 : f32
    %17 = vector.broadcast %cst_11 : f32 to vector<8x8xf32>
    %18 = arith.mulf %16, %17 : vector<8x8xf32>
    %19 = vector.broadcast %12 : vector<1x8xf32> to vector<8x8xf32>
    %20 = arith.addf %18, %19 : vector<8x8xf32>
    %cst_12 = arith.constant dense<0xFF800000> : vector<8xf32>
    %21 = vector.multi_reduction <maximumf>, %20, %cst_12 [1] : vector<8x8xf32> to vector<8xf32>
    %22 = vector.shape_cast %21 : vector<8xf32> to vector<8x1xf32>
    %23 = vector.broadcast %22 : vector<8x1xf32> to vector<8x8xf32>
    %24 = arith.subf %20, %23 : vector<8x8xf32>
    %25 = math.exp %24 : vector<8x8xf32>
    %cst_13 = arith.constant dense<0.000000e+00> : vector<8xf32>
    %26 = vector.multi_reduction <add>, %25, %cst_13 [1] : vector<8x8xf32> to vector<8xf32>
    %27 = vector.shape_cast %26 : vector<8xf32> to vector<8x1xf32>
    %28 = tpu.reciprocal %27 {approx = true} : vector<8x1xf32> -> vector<8x1xf32>
    %29 = vector.broadcast %28 : vector<8x1xf32> to vector<8x8xf32>
    %30 = arith.mulf %25, %29 : vector<8x8xf32>
    %cst_14 = arith.constant dense<0.000000e+00> : vector<8x16xf32>
    %31 = tpu.matmul %30, %15, %cst_14 {dimension_numbers = #tpu.dot_dimension_numbers<[1], [0], [0], [1], [0, 0, 1, 1], [], []>} : vector<8x8xf32>, vector<8x16xf32>, vector<8x16xf32> -> vector<8x16xf32>
    %32 = vector.extract_strided_slice %10 {offsets = [0, 16], sizes = [8, 16], strides = [1, 1]} : vector<16x96xf32> to vector<8x16xf32>
    %33 = vector.extract_strided_slice %10 {offsets = [0, 48], sizes = [8, 16], strides = [1, 1]} : vector<16x96xf32> to vector<8x16xf32>
    %34 = vector.extract_strided_slice %10 {offsets = [0, 80], sizes = [8, 16], strides = [1, 1]} : vector<16x96xf32> to vector<8x16xf32>
    %cst_15 = arith.constant dense<0.000000e+00> : vector<8x8xf32>
    %35 = tpu.matmul %32, %33, %cst_15 {dimension_numbers = #tpu.dot_dimension_numbers<[1], [1], [0], [0], [0, 0, 1, 0], [], []>} : vector<8x16xf32>, vector<8x16xf32>, vector<8x8xf32> -> vector<8x8xf32>
    %cst_16 = arith.constant 2.500000e-01 : f32
    %36 = vector.broadcast %cst_16 : f32 to vector<8x8xf32>
    %37 = arith.mulf %35, %36 : vector<8x8xf32>
    %38 = vector.broadcast %12 : vector<1x8xf32> to vector<8x8xf32>
    %39 = arith.addf %37, %38 : vector<8x8xf32>
    %cst_17 = arith.constant dense<0xFF800000> : vector<8xf32>
    %40 = vector.multi_reduction <maximumf>, %39, %cst_17 [1] : vector<8x8xf32> to vector<8xf32>
    %41 = vector.shape_cast %40 : vector<8xf32> to vector<8x1xf32>
    %42 = vector.broadcast %41 : vector<8x1xf32> to vector<8x8xf32>
    %43 = arith.subf %39, %42 : vector<8x8xf32>
    %44 = math.exp %43 : vector<8x8xf32>
    %cst_18 = arith.constant dense<0.000000e+00> : vector<8xf32>
    %45 = vector.multi_reduction <add>, %44, %cst_18 [1] : vector<8x8xf32> to vector<8xf32>
    %46 = vector.shape_cast %45 : vector<8xf32> to vector<8x1xf32>
    %47 = tpu.reciprocal %46 {approx = true} : vector<8x1xf32> -> vector<8x1xf32>
    %48 = vector.broadcast %47 : vector<8x1xf32> to vector<8x8xf32>
    %49 = arith.mulf %44, %48 : vector<8x8xf32>
    %cst_19 = arith.constant dense<0.000000e+00> : vector<8x16xf32>
    %50 = tpu.matmul %49, %34, %cst_19 {dimension_numbers = #tpu.dot_dimension_numbers<[1], [0], [0], [1], [0, 0, 1, 1], [], []>} : vector<8x8xf32>, vector<8x16xf32>, vector<8x16xf32> -> vector<8x16xf32>
    %51 = tpu.concatenate %31, %50 in 1 : vector<8x16xf32>, vector<8x16xf32> -> vector<8x32xf32>
    %52 = vector.extract_strided_slice %11 {offsets = [1, 0], sizes = [1, 8], strides = [1, 1]} : vector<2x8xf32> to vector<1x8xf32>
    %53 = vector.extract_strided_slice %10 {offsets = [8, 0], sizes = [8, 16], strides = [1, 1]} : vector<16x96xf32> to vector<8x16xf32>
    %54 = vector.extract_strided_slice %10 {offsets = [8, 32], sizes = [8, 16], strides = [1, 1]} : vector<16x96xf32> to vector<8x16xf32>
    %55 = vector.extract_strided_slice %10 {offsets = [8, 64], sizes = [8, 16], strides = [1, 1]} : vector<16x96xf32> to vector<8x16xf32>
    %cst_20 = arith.constant dense<0.000000e+00> : vector<8x8xf32>
    %56 = tpu.matmul %53, %54, %cst_20 {dimension_numbers = #tpu.dot_dimension_numbers<[1], [1], [0], [0], [0, 0, 1, 0], [], []>} : vector<8x16xf32>, vector<8x16xf32>, vector<8x8xf32> -> vector<8x8xf32>
    %cst_21 = arith.constant 2.500000e-01 : f32
    %57 = vector.broadcast %cst_21 : f32 to vector<8x8xf32>
    %58 = arith.mulf %56, %57 : vector<8x8xf32>
    %59 = vector.broadcast %52 : vector<1x8xf32> to vector<8x8xf32>
    %60 = arith.addf %58, %59 : vector<8x8xf32>
    %cst_22 = arith.constant dense<0xFF800000> : vector<8xf32>
    %61 = vector.multi_reduction <maximumf>, %60, %cst_22 [1] : vector<8x8xf32> to vector<8xf32>
    %62 = vector.shape_cast %61 : vector<8xf32> to vector<8x1xf32>
    %63 = vector.broadcast %62 : vector<8x1xf32> to vector<8x8xf32>
    %64 = arith.subf %60, %63 : vector<8x8xf32>
    %65 = math.exp %64 : vector<8x8xf32>
    %cst_23 = arith.constant dense<0.000000e+00> : vector<8xf32>
    %66 = vector.multi_reduction <add>, %65, %cst_23 [1] : vector<8x8xf32> to vector<8xf32>
    %67 = vector.shape_cast %66 : vector<8xf32> to vector<8x1xf32>
    %68 = tpu.reciprocal %67 {approx = true} : vector<8x1xf32> -> vector<8x1xf32>
    %69 = vector.broadcast %68 : vector<8x1xf32> to vector<8x8xf32>
    %70 = arith.mulf %65, %69 : vector<8x8xf32>
    %cst_24 = arith.constant dense<0.000000e+00> : vector<8x16xf32>
    %71 = tpu.matmul %70, %55, %cst_24 {dimension_numbers = #tpu.dot_dimension_numbers<[1], [0], [0], [1], [0, 0, 1, 1], [], []>} : vector<8x8xf32>, vector<8x16xf32>, vector<8x16xf32> -> vector<8x16xf32>
    %72 = vector.extract_strided_slice %10 {offsets = [8, 16], sizes = [8, 16], strides = [1, 1]} : vector<16x96xf32> to vector<8x16xf32>
    %73 = vector.extract_strided_slice %10 {offsets = [8, 48], sizes = [8, 16], strides = [1, 1]} : vector<16x96xf32> to vector<8x16xf32>
    %74 = vector.extract_strided_slice %10 {offsets = [8, 80], sizes = [8, 16], strides = [1, 1]} : vector<16x96xf32> to vector<8x16xf32>
    %cst_25 = arith.constant dense<0.000000e+00> : vector<8x8xf32>
    %75 = tpu.matmul %72, %73, %cst_25 {dimension_numbers = #tpu.dot_dimension_numbers<[1], [1], [0], [0], [0, 0, 1, 0], [], []>} : vector<8x16xf32>, vector<8x16xf32>, vector<8x8xf32> -> vector<8x8xf32>
    %cst_26 = arith.constant 2.500000e-01 : f32
    %76 = vector.broadcast %cst_26 : f32 to vector<8x8xf32>
    %77 = arith.mulf %75, %76 : vector<8x8xf32>
    %78 = vector.broadcast %52 : vector<1x8xf32> to vector<8x8xf32>
    %79 = arith.addf %77, %78 : vector<8x8xf32>
    %cst_27 = arith.constant dense<0xFF800000> : vector<8xf32>
    %80 = vector.multi_reduction <maximumf>, %79, %cst_27 [1] : vector<8x8xf32> to vector<8xf32>
    %81 = vector.shape_cast %80 : vector<8xf32> to vector<8x1xf32>
    %82 = vector.broadcast %81 : vector<8x1xf32> to vector<8x8xf32>
    %83 = arith.subf %79, %82 : vector<8x8xf32>
    %84 = math.exp %83 : vector<8x8xf32>
    %cst_28 = arith.constant dense<0.000000e+00> : vector<8xf32>
    %85 = vector.multi_reduction <add>, %84, %cst_28 [1] : vector<8x8xf32> to vector<8xf32>
    %86 = vector.shape_cast %85 : vector<8xf32> to vector<8x1xf32>
    %87 = tpu.reciprocal %86 {approx = true} : vector<8x1xf32> -> vector<8x1xf32>
    %88 = vector.broadcast %87 : vector<8x1xf32> to vector<8x8xf32>
    %89 = arith.mulf %84, %88 : vector<8x8xf32>
    %cst_29 = arith.constant dense<0.000000e+00> : vector<8x16xf32>
    %90 = tpu.matmul %89, %74, %cst_29 {dimension_numbers = #tpu.dot_dimension_numbers<[1], [0], [0], [1], [0, 0, 1, 1], [], []>} : vector<8x8xf32>, vector<8x16xf32>, vector<8x16xf32> -> vector<8x16xf32>
    %91 = tpu.concatenate %71, %90 in 1 : vector<8x16xf32>, vector<8x16xf32> -> vector<8x32xf32>
    %92 = tpu.concatenate %51, %91 in 0 : vector<8x32xf32>, vector<8x32xf32> -> vector<16x32xf32>
    %c0_30 = arith.constant 0 : index
    %c0_31 = arith.constant 0 : index
    %c0_32 = arith.constant 0 : index
    %93 = vector.load %arg7[%c0_30, %c0_31, %c0_32] : memref<1x32x32xf32, #tpu.memory_space<vmem>>, vector<1x32x32xf32>
    %94 = vector.shape_cast %93 : vector<1x32x32xf32> to vector<32x32xf32>
    %cst_33 = arith.constant dense<0.000000e+00> : vector<16x32xf32>
    %95 = tpu.matmul %92, %94, %cst_33 {dimension_numbers = #tpu.dot_dimension_numbers<[1], [0], [0], [1], [0, 0, 1, 1], [], []>} : vector<16x32xf32>, vector<32x32xf32>, vector<16x32xf32> -> vector<16x32xf32>
    %c0_34 = arith.constant 0 : index
    %c0_35 = arith.constant 0 : index
    %c0_36 = arith.constant 0 : index
    %96 = vector.load %arg8[%c0_34, %c0_35, %c0_36] : memref<1x1x32xf32, #tpu.memory_space<vmem>>, vector<1x1x32xf32>
    %97 = vector.shape_cast %96 : vector<1x1x32xf32> to vector<1x32xf32>
    %98 = vector.broadcast %97 : vector<1x32xf32> to vector<16x32xf32>
    %99 = arith.addf %95, %98 : vector<16x32xf32>
    %100 = arith.addf %99, %3 : vector<16x32xf32>
    %c0_37 = arith.constant 0 : index
    %c0_38 = arith.constant 0 : index
    %c0_39 = arith.constant 0 : index
    %101 = vector.load %arg9[%c0_37, %c0_38, %c0_39] : memref<1x1x32xf32, #tpu.memory_space<vmem>>, vector<1x1x32xf32>
    %102 = vector.shape_cast %101 : vector<1x1x32xf32> to vector<1x32xf32>
    %c0_40 = arith.constant 0 : index
    %c0_41 = arith.constant 0 : index
    %c0_42 = arith.constant 0 : index
    %103 = vector.load %arg10[%c0_40, %c0_41, %c0_42] : memref<1x1x32xf32, #tpu.memory_space<vmem>>, vector<1x1x32xf32>
    %104 = vector.shape_cast %103 : vector<1x1x32xf32> to vector<1x32xf32>
    %cst_43 = arith.constant dense<0.000000e+00> : vector<16xf32>
    %105 = vector.multi_reduction <add>, %100, %cst_43 [1] : vector<16x32xf32> to vector<16xf32>
    %106 = vector.shape_cast %105 : vector<16xf32> to vector<16x1xf32>
    %cst_44 = arith.constant 3.200000e+01 : f32
    %107 = vector.broadcast %cst_44 : f32 to vector<16x1xf32>
    %108 = arith.divf %106, %107 : vector<16x1xf32>
    %109 = vector.broadcast %108 : vector<16x1xf32> to vector<16x32xf32>
    %110 = arith.subf %100, %109 : vector<16x32xf32>
    %111 = arith.mulf %110, %110 : vector<16x32xf32>
    %cst_45 = arith.constant dense<0.000000e+00> : vector<16xf32>
    %112 = vector.multi_reduction <add>, %111, %cst_45 [1] : vector<16x32xf32> to vector<16xf32>
    %113 = vector.shape_cast %112 : vector<16xf32> to vector<16x1xf32>
    %cst_46 = arith.constant 3.200000e+01 : f32
    %114 = vector.broadcast %cst_46 : f32 to vector<16x1xf32>
    %115 = arith.divf %113, %114 : vector<16x1xf32>
    %116 = vector.broadcast %108 : vector<16x1xf32> to vector<16x32xf32>
    %117 = arith.subf %100, %116 : vector<16x32xf32>
    %cst_47 = arith.constant 9.99999996E-13 : f32
    %118 = vector.broadcast %cst_47 : f32 to vector<16x1xf32>
    %119 = arith.addf %115, %118 : vector<16x1xf32>
    %120 = math.rsqrt %119 : vector<16x1xf32>
    %121 = vector.broadcast %120 : vector<16x1xf32> to vector<16x32xf32>
    %122 = arith.mulf %117, %121 : vector<16x32xf32>
    %123 = vector.broadcast %102 : vector<1x32xf32> to vector<16x32xf32>
    %124 = arith.mulf %122, %123 : vector<16x32xf32>
    %125 = vector.broadcast %104 : vector<1x32xf32> to vector<16x32xf32>
    %126 = arith.addf %124, %125 : vector<16x32xf32>
    %c0_48 = arith.constant 0 : index
    %c0_49 = arith.constant 0 : index
    %c0_50 = arith.constant 0 : index
    %127 = vector.load %arg11[%c0_48, %c0_49, %c0_50] : memref<1x32x64xf32, #tpu.memory_space<vmem>>, vector<1x32x64xf32>
    %128 = vector.shape_cast %127 : vector<1x32x64xf32> to vector<32x64xf32>
    %cst_51 = arith.constant dense<0.000000e+00> : vector<16x64xf32>
    %129 = tpu.matmul %126, %128, %cst_51 {dimension_numbers = #tpu.dot_dimension_numbers<[1], [0], [0], [1], [0, 0, 1, 1], [], []>} : vector<16x32xf32>, vector<32x64xf32>, vector<16x64xf32> -> vector<16x64xf32>
    %c0_52 = arith.constant 0 : index
    %c0_53 = arith.constant 0 : index
    %c0_54 = arith.constant 0 : index
    %130 = vector.load %arg12[%c0_52, %c0_53, %c0_54] : memref<1x1x64xf32, #tpu.memory_space<vmem>>, vector<1x1x64xf32>
    %131 = vector.shape_cast %130 : vector<1x1x64xf32> to vector<1x64xf32>
    %132 = vector.broadcast %131 : vector<1x64xf32> to vector<16x64xf32>
    %133 = arith.addf %129, %132 : vector<16x64xf32>
    %cst_55 = arith.constant 5.000000e-01 : f32
    %134 = vector.broadcast %cst_55 : f32 to vector<16x64xf32>
    %135 = arith.mulf %134, %133 : vector<16x64xf32>
    %cst_56 = arith.constant 4.471500e-02 : f32
    %136 = vector.broadcast %cst_56 : f32 to vector<16x64xf32>
    %137 = arith.mulf %136, %133 : vector<16x64xf32>
    %138 = arith.mulf %137, %133 : vector<16x64xf32>
    %139 = arith.mulf %138, %133 : vector<16x64xf32>
    %140 = arith.addf %133, %139 : vector<16x64xf32>
    %cst_57 = arith.constant 0.797884583 : f32
    %141 = vector.broadcast %cst_57 : f32 to vector<16x64xf32>
    %142 = arith.mulf %141, %140 : vector<16x64xf32>
    %143 = math.tanh %142 : vector<16x64xf32>
    %cst_58 = arith.constant 1.000000e+00 : f32
    %144 = vector.broadcast %cst_58 : f32 to vector<16x64xf32>
    %145 = arith.addf %144, %143 : vector<16x64xf32>
    %146 = arith.mulf %135, %145 : vector<16x64xf32>
    %c0_59 = arith.constant 0 : index
    %c0_60 = arith.constant 0 : index
    %c0_61 = arith.constant 0 : index
    %147 = vector.load %arg13[%c0_59, %c0_60, %c0_61] : memref<1x64x32xf32, #tpu.memory_space<vmem>>, vector<1x64x32xf32>
    %148 = vector.shape_cast %147 : vector<1x64x32xf32> to vector<64x32xf32>
    %cst_62 = arith.constant dense<0.000000e+00> : vector<16x32xf32>
    %149 = tpu.matmul %146, %148, %cst_62 {dimension_numbers = #tpu.dot_dimension_numbers<[1], [0], [0], [1], [0, 0, 1, 1], [], []>} : vector<16x64xf32>, vector<64x32xf32>, vector<16x32xf32> -> vector<16x32xf32>
    %c0_63 = arith.constant 0 : index
    %c0_64 = arith.constant 0 : index
    %c0_65 = arith.constant 0 : index
    %150 = vector.load %arg14[%c0_63, %c0_64, %c0_65] : memref<1x1x32xf32, #tpu.memory_space<vmem>>, vector<1x1x32xf32>
    %151 = vector.shape_cast %150 : vector<1x1x32xf32> to vector<1x32xf32>
    %152 = vector.broadcast %151 : vector<1x32xf32> to vector<16x32xf32>
    %153 = arith.addf %149, %152 : vector<16x32xf32>
    %154 = arith.addf %153, %126 : vector<16x32xf32>
    %c0_66 = arith.constant 0 : index
    %c0_67 = arith.constant 0 : index
    %c0_68 = arith.constant 0 : index
    %155 = vector.load %arg15[%c0_66, %c0_67, %c0_68] : memref<1x1x32xf32, #tpu.memory_space<vmem>>, vector<1x1x32xf32>
    %156 = vector.shape_cast %155 : vector<1x1x32xf32> to vector<1x32xf32>
    %c0_69 = arith.constant 0 : index
    %c0_70 = arith.constant 0 : index
    %c0_71 = arith.constant 0 : index
    %157 = vector.load %arg16[%c0_69, %c0_70, %c0_71] : memref<1x1x32xf32, #tpu.memory_space<vmem>>, vector<1x1x32xf32>
    %158 = vector.shape_cast %157 : vector<1x1x32xf32> to vector<1x32xf32>
    %cst_72 = arith.constant dense<0.000000e+00> : vector<16xf32>
    %159 = vector.multi_reduction <add>, %154, %cst_72 [1] : vector<16x32xf32> to vector<16xf32>
    %160 = vector.shape_cast %159 : vector<16xf32> to vector<16x1xf32>
    %cst_73 = arith.constant 3.200000e+01 : f32
    %161 = vector.broadcast %cst_73 : f32 to vector<16x1xf32>
    %162 = arith.divf %160, %161 : vector<16x1xf32>
    %163 = vector.broadcast %162 : vector<16x1xf32> to vector<16x32xf32>
    %164 = arith.subf %154, %163 : vector<16x32xf32>
    %165 = arith.mulf %164, %164 : vector<16x32xf32>
    %cst_74 = arith.constant dense<0.000000e+00> : vector<16xf32>
    %166 = vector.multi_reduction <add>, %165, %cst_74 [1] : vector<16x32xf32> to vector<16xf32>
    %167 = vector.shape_cast %166 : vector<16xf32> to vector<16x1xf32>
    %cst_75 = arith.constant 3.200000e+01 : f32
    %168 = vector.broadcast %cst_75 : f32 to vector<16x1xf32>
    %169 = arith.divf %167, %168 : vector<16x1xf32>
    %170 = vector.broadcast %162 : vector<16x1xf32> to vector<16x32xf32>
    %171 = arith.subf %154, %170 : vector<16x32xf32>
    %cst_76 = arith.constant 9.99999996E-13 : f32
    %172 = vector.broadcast %cst_76 : f32 to vector<16x1xf32>
    %173 = arith.addf %169, %172 : vector<16x1xf32>
    %174 = math.rsqrt %173 : vector<16x1xf32>
    %175 = vector.broadcast %174 : vector<16x1xf32> to vector<16x32xf32>
    %176 = arith.mulf %171, %175 : vector<16x32xf32>
    %177 = vector.broadcast %156 : vector<1x32xf32> to vector<16x32xf32>
    %178 = arith.mulf %176, %177 : vector<16x32xf32>
    %179 = vector.broadcast %158 : vector<1x32xf32> to vector<16x32xf32>
    %180 = arith.addf %178, %179 : vector<16x32xf32>
    %c0_77 = arith.constant 0 : index
    %c0_78 = arith.constant 0 : index
    %181 = vector.load %arg22[%c0_77, %c0_78] : memref<16x32xf32, #tpu.memory_space<vmem>>, vector<16x32xf32>
    tpu.vector_store %arg22[%c0_77, %c0_78], %180 {strides = array<i32>} : memref<16x32xf32, #tpu.memory_space<vmem>>, vector<16x32xf32>,
    %c1_i32 = arith.constant 1 : i32
    %182 = arith.cmpi eq, %arg0, %c1_i32 : i32
    %183 = arith.extui %182 : i1 to i32
    %c0_i32_79 = arith.constant 0 : i32
    %184 = arith.cmpi ne, %183, %c0_i32_79 : i32
    scf.if %184 {
      %185 = vector.extract_strided_slice %180 {offsets = [0, 0], sizes = [1, 32], strides = [1, 1]} : vector<16x32xf32> to vector<1x32xf32>
      %186 = vector.extract_strided_slice %180 {offsets = [8, 0], sizes = [1, 32], strides = [1, 1]} : vector<16x32xf32> to vector<1x32xf32>
      %187 = tpu.concatenate %185, %186 in 0 : vector<1x32xf32>, vector<1x32xf32> -> vector<2x32xf32>
      %c0_80 = arith.constant 0 : index
      %c0_81 = arith.constant 0 : index
      %188 = vector.load %arg17[%c0_80, %c0_81] : memref<32x32xf32, #tpu.memory_space<vmem>>, vector<32x32xf32>
      %cst_82 = arith.constant dense<0.000000e+00> : vector<2x32xf32>
      %189 = tpu.matmul %187, %188, %cst_82 {dimension_numbers = #tpu.dot_dimension_numbers<[1], [0], [0], [1], [0, 0, 1, 1], [], []>} : vector<2x32xf32>, vector<32x32xf32>, vector<2x32xf32> -> vector<2x32xf32>
      %c0_83 = arith.constant 0 : index
      %c0_84 = arith.constant 0 : index
      %190 = vector.load %arg18[%c0_83, %c0_84] : memref<1x32xf32, #tpu.memory_space<vmem>>, vector<1x32xf32>
      %191 = vector.broadcast %190 : vector<1x32xf32> to vector<2x32xf32>
      %192 = arith.addf %189, %191 : vector<2x32xf32>
      %193 = math.tanh %192 : vector<2x32xf32>
      %c0_85 = arith.constant 0 : index
      %c0_86 = arith.constant 0 : index
      %194 = vector.load %arg19[%c0_85, %c0_86] : memref<32x3xf32, #tpu.memory_space<vmem>>, vector<32x3xf32>
      %cst_87 = arith.constant dense<0.000000e+00> : vector<2x3xf32>
      %195 = tpu.matmul %193, %194, %cst_87 {dimension_numbers = #tpu.dot_dimension_numbers<[1], [0], [0], [1], [0, 0, 1, 1], [], []>} : vector<2x32xf32>, vector<32x3xf32>, vector<2x3xf32> -> vector<2x3xf32>
      %c0_88 = arith.constant 0 : index
      %c0_89 = arith.constant 0 : index
      %196 = vector.load %arg20[%c0_88, %c0_89] : memref<1x3xf32, #tpu.memory_space<vmem>>, vector<1x3xf32>
      %197 = vector.broadcast %196 : vector<1x3xf32> to vector<2x3xf32>
      %198 = arith.addf %195, %197 : vector<2x3xf32>
      %c0_90 = arith.constant 0 : index
      %c0_91 = arith.constant 0 : index
      %199 = vector.load %arg21[%c0_90, %c0_91] : memref<2x3xf32, #tpu.memory_space<vmem>>, vector<2x3xf32>
      tpu.vector_store %arg21[%c0_90, %c0_91], %198 {strides = array<i32>} : memref<2x3xf32, #tpu.memory_space<vmem>>, vector<2x3xf32>,
    } else {
    }
    return
  }
  func.func @transform_0(%arg0: i32) -> (i32, i32) {
    %c0_i32 = arith.constant 0 : i32
    %c0_i32_0 = arith.constant 0 : i32
    %c0_i32_1 = arith.constant 0 : i32
    return %c0_i32, %c0_i32_0 : i32, i32
  }
  func.func @transform_1(%arg0: i32) -> (i32, i32) {
    %c0_i32 = arith.constant 0 : i32
    %c0_i32_0 = arith.constant 0 : i32
    %c0_i32_1 = arith.constant 0 : i32
    return %c0_i32, %c0_i32_0 : i32, i32
  }
  func.func @transform_2(%arg0: i32) -> (i32, i32) {
    %c0_i32 = arith.constant 0 : i32
    %c0_i32_0 = arith.constant 0 : i32
    %c0_i32_1 = arith.constant 0 : i32
    return %c0_i32, %c0_i32_0 : i32, i32
  }
  func.func @transform_3(%arg0: i32) -> (i32, i32) {
    %c0_i32 = arith.constant 0 : i32
    %c0_i32_0 = arith.constant 0 : i32
    %c0_i32_1 = arith.constant 0 : i32
    return %c0_i32, %c0_i32_0 : i32, i32
  }
  func.func @transform_4(%arg0: i32) -> (i32, i32, i32) {
    %c0_i32 = arith.constant 0 : i32
    %c0_i32_0 = arith.constant 0 : i32
    %c0_i32_1 = arith.constant 0 : i32
    return %arg0, %c0_i32, %c0_i32_0 : i32, i32, i32
  }
  func.func @transform_5(%arg0: i32) -> (i32, i32, i32) {
    %c0_i32 = arith.constant 0 : i32
    %c0_i32_0 = arith.constant 0 : i32
    %c0_i32_1 = arith.constant 0 : i32
    return %arg0, %c0_i32, %c0_i32_0 : i32, i32, i32
  }
  func.func @transform_6(%arg0: i32) -> (i32, i32, i32) {
    %c0_i32 = arith.constant 0 : i32
    %c0_i32_0 = arith.constant 0 : i32
    %c0_i32_1 = arith.constant 0 : i32
    return %arg0, %c0_i32, %c0_i32_0 : i32, i32, i32
  }
  func.func @transform_7(%arg0: i32) -> (i32, i32, i32) {
    %c0_i32 = arith.constant 0 : i32
    %c0_i32_0 = arith.constant 0 : i32
    %c0_i32_1 = arith.constant 0 : i32
    return %arg0, %c0_i32, %c0_i32_0 : i32, i32, i32
  }
  func.func @transform_8(%arg0: i32) -> (i32, i32, i32) {
    %c0_i32 = arith.constant 0 : i32
    %c0_i32_0 = arith.constant 0 : i32
    %c0_i32_1 = arith.constant 0 : i32
    return %arg0, %c0_i32, %c0_i32_0 : i32, i32, i32
  }
  func.func @transform_9(%arg0: i32) -> (i32, i32, i32) {
    %c0_i32 = arith.constant 0 : i32
    %c0_i32_0 = arith.constant 0 : i32
    %c0_i32_1 = arith.constant 0 : i32
    return %arg0, %c0_i32, %c0_i32_0 : i32, i32, i32
  }
  func.func @transform_10(%arg0: i32) -> (i32, i32, i32) {
    %c0_i32 = arith.constant 0 : i32
    %c0_i32_0 = arith.constant 0 : i32
    %c0_i32_1 = arith.constant 0 : i32
    return %arg0, %c0_i32, %c0_i32_0 : i32, i32, i32
  }
  func.func @transform_11(%arg0: i32) -> (i32, i32, i32) {
    %c0_i32 = arith.constant 0 : i32
    %c0_i32_0 = arith.constant 0 : i32
    %c0_i32_1 = arith.constant 0 : i32
    return %arg0, %c0_i32, %c0_i32_0 : i32, i32, i32
  }
  func.func @transform_12(%arg0: i32) -> (i32, i32, i32) {
    %c0_i32 = arith.constant 0 : i32
    %c0_i32_0 = arith.constant 0 : i32
    %c0_i32_1 = arith.constant 0 : i32
    return %arg0, %c0_i32, %c0_i32_0 : i32, i32, i32
  }
  func.func @transform_13(%arg0: i32) -> (i32, i32, i32) {
    %c0_i32 = arith.constant 0 : i32
    %c0_i32_0 = arith.constant 0 : i32
    %c0_i32_1 = arith.constant 0 : i32
    return %arg0, %c0_i32, %c0_i32_0 : i32, i32, i32
  }
  func.func @transform_14(%arg0: i32) -> (i32, i32, i32) {
    %c0_i32 = arith.constant 0 : i32
    %c0_i32_0 = arith.constant 0 : i32
    %c0_i32_1 = arith.constant 0 : i32
    return %arg0, %c0_i32, %c0_i32_0 : i32, i32, i32
  }
  func.func @transform_15(%arg0: i32) -> (i32, i32, i32) {
    %c0_i32 = arith.constant 0 : i32
    %c0_i32_0 = arith.constant 0 : i32
    %c0_i32_1 = arith.constant 0 : i32
    return %arg0, %c0_i32, %c0_i32_0 : i32, i32, i32
  }
  func.func @transform_16(%arg0: i32) -> (i32, i32) {
    %c0_i32 = arith.constant 0 : i32
    %c0_i32_0 = arith.constant 0 : i32
    %c0_i32_1 = arith.constant 0 : i32
    return %c0_i32, %c0_i32_0 : i32, i32
  }
  func.func @transform_17(%arg0: i32) -> (i32, i32) {
    %c0_i32 = arith.constant 0 : i32
    %c0_i32_0 = arith.constant 0 : i32
    %c0_i32_1 = arith.constant 0 : i32
    return %c0_i32, %c0_i32_0 : i32, i32
  }
  func.func @transform_18(%arg0: i32) -> (i32, i32) {
    %c0_i32 = arith.constant 0 : i32
    %c0_i32_0 = arith.constant 0 : i32
    %c0_i32_1 = arith.constant 0 : i32
    return %c0_i32, %c0_i32_0 : i32, i32
  }
  func.func @transform_19(%arg0: i32) -> (i32, i32) {
    %c0_i32 = arith.constant 0 : i32
    %c0_i32_0 = arith.constant 0 : i32
    %c0_i32_1 = arith.constant 0 : i32
    return %c0_i32, %c0_i32_0 : i32, i32
  }
  func.func @transform_20(%arg0: i32) -> (i32, i32) {
    %c0_i32 = arith.constant 0 : i32
    %c0_i32_0 = arith.constant 0 : i32
    %c0_i32_1 = arith.constant 0 : i32
    return %c0_i32, %c0_i32_0 : i32, i32
  }
}

</mosaic_0001>

<bundles_post_ra>
// kernel: bert_forward.1
= control target key start
LH: loop header
LB: loop body
LE: loop exit
PB: predicated region body
PF: predicated region fallthrough
CT: control target
= control target key end

     0   :  { %s3140_s0 = inlined_call_operand.vmem [shape: f32[16,32], index: 0, kind: input, shape index: {}]   ;;  %s3141_s1 = inlined_call_operand.vmem [shape: f32[1,32], index: 1, kind: input, shape index: {}]   ;;  %s3142_s2 = inlined_call_operand.vmem [shape: f32[1,32], index: 2, kind: input, shape index: {}]   ;;  %s3143_s3 = inlined_call_operand.vmem [shape: f32[2,8], index: 3, kind: input, shape index: {}]   ;;  %s3144_s4 = inlined_call_operand.vmem [shape: f32[2,32,96], index: 4, kind: input, shape index: {}]   ;;  %s3145_s5 = inlined_call_operand.vmem [shape: f32[2,1,96], index: 5, kind: input, shape index: {}]   ;;  %s3146_s6 = inlined_call_operand.vmem [shape: f32[2,32,32], index: 6, kind: input, shape index: {}]   ;;  %s3147_s7 = inlined_call_operand.vmem [shape: f32[2,1,32], index: 7, kind: input, shape index: {}]   ;;  %s3148_s8 = inlined_call_operand.vmem [shape: f32[2,1,32], index: 8, kind: input, shape index: {}]   ;;  %s3149_s9 = inlined_call_operand.vmem [shape: f32[2,1,32], index: 9, kind: input, shape index: {}]   ;;  %s3150_s10 = inlined_call_operand.vmem [shape: f32[2,32,64], index: 10, kind: input, shape index: {}]   ;;  %s3151_s11 = inlined_call_operand.vmem [shape: f32[2,1,64], index: 11, kind: input, shape index: {}]   ;;  %s3152_s12 = inlined_call_operand.vmem [shape: f32[2,64,32], index: 12, kind: input, shape index: {}]   ;;  %s3153_s13 = inlined_call_operand.vmem [shape: f32[2,1,32], index: 13, kind: input, shape index: {}]   ;;  %s3154_s14 = inlined_call_operand.vmem [shape: f32[2,1,32], index: 14, kind: input, shape index: {}]   ;;  %s3155_s15 = inlined_call_operand.vmem [shape: f32[2,1,32], index: 15, kind: input, shape index: {}]   ;;  %s3156_s16 = inlined_call_operand.vmem [shape: f32[32,32], index: 16, kind: input, shape index: {}]   ;;  %s3157_s17 = inlined_call_operand.vmem [shape: f32[1,32], index: 17, kind: input, shape index: {}]   ;;  %s3158_s18 = inlined_call_operand.vmem [shape: f32[32,3], index: 18, kind: input, shape index: {}]   ;;  %s3159_s19 = inlined_call_operand.vmem [shape: f32[1,3], index: 19, kind: input, shape index: {}]   ;;  %s3160_s20 = inlined_call_operand.hbm [shape: f32[2,3], index: 20, kind: output, shape index: {}]  }
   0x1   :  { %3166 = sst [smem:[#allocation7_spill]] %s3140_s0 }
   0x2   :  { %3167 = sst [smem:[#allocation8_spill]] %s3141_s1 }
   0x3   :  { %3168 = sst [smem:[#allocation9_spill]] %s3142_s2 }
   0x4   :  { %3169 = sst [smem:[#allocation10_spill]] %s3143_s3 }
   0x5   :  { %3170 = sst [smem:[#allocation11_spill]] %s3144_s4 }
   0x6   :  { %3171 = sst [smem:[#allocation12_spill]] %s3146_s6 }
   0x7   :  { %3172 = sst [smem:[#allocation13_spill]] %s3156_s16 }
   0x8   :  { %3173 = sst [smem:[#allocation14_spill]] %s3157_s17 }
   0x9   :  { %3174 = sst [smem:[#allocation15_spill]] %s3158_s18 }
   0xa   :  { %3175 = sst [smem:[#allocation16_spill]] %s3159_s19 }
   0xb   :  { %3176 = sst [smem:[#allocation17_spill]] %s3160_s20 }
   0xc   :  { %25 = vsyncpa [#allocation4], 0  ;;  %s2843_s1 = smov 0  }
   0xd LB: > { %3177 = sst [smem:[#allocation6_spill]] %s2724_s1  ;;  %s2849_s22 = sadd.s32 4294967295, %s2724_s1   ;;  %s2724_s1 = sphi %s2843_s1, %s31_s1  }
   0xe   : > { %p2355_p0 = scmp.ge.s32.totalorder %s2724_s1, 1  ;;  %p652_p1 = scmp.lt.s32.totalorder %s2724_s1, 3 }
  0x10   : > { %p653_p2 = pnand %p2355_p0, %p652_p1 }
  0x11   : > { %p744_p3 = scmp.lt.s32.totalorder (!%p653_p2), %s2849_s22, 1  ;;  %s3178_s28 = sld [smem:[#allocation11_spill]] (!%p653_p2) }
  0x12   : > { %656 = sbr.rel (%p653_p2) target bundleno = 3343 (0xd0f), region = 100  ;;  %s3179_s6 = sld [smem:[#allocation12_spill]] (!%p653_p2) }
  0x13   : > { %p2364_p4 = scmp.ne.s32.totalorder (!%p653_p2), %s2849_s22, 0 }
  0x19   : > { %s2855_s23 = scalar_select %p744_p3, %s2849_s22, 1 }
  0x1a   : > { %791 = sbr.rel (%p2364_p4) target bundleno = 351 (0x15f), region = 104  ;;  %s3180_s1 = sld [smem:[#allocation7_spill]] (!%p2364_p4)  ;;  %vm796_vm0 = vcmask (!%p2364_p4), 261120  }
  0x1b   : > { %s2404_s24 = sshll.u32 %s2855_s23, 5  ;;  %s2407_s16 = sshll.u32 %s2855_s23, 6 }
  0x1c   : > { %s2865_s4 = scalar_lea.vmem %s3178_s28, %s2404_s24  ;;  %s2870_s0 = scalar_lea.vmem %s3179_s6, %s2404_s24 }
  0x1d   : > { %s2887_s28 = scalar_lea.vmem %s3150_s10, %s2404_s24  ;;  %s2897_s20 = scalar_lea.vmem %s3152_s12, %s2407_s16 }
  0x1e   : > { %s781_s2 = scalar_lea.vmem %s3153_s13, %s2855_s23  ;;  %s784_s26 = scalar_lea.vmem %s3154_s14, %s2855_s23 }
  0x1f   : > { %s787_s18 = scalar_lea.vmem %s3155_s15, %s2855_s23  ;;  %s3182_s17 = sld [smem:[#allocation8_spill]] (!%p2364_p4) }
  0x20   : > { %s3181_s21 = smov (!%p2364_p4), %s3180_s1  ;;  %v792_v0 = vld [vmem:[%s3180_s1] sm:$0xff] (!%p2364_p4)  ;;  %s3183_s24 = sld [smem:[#allocation9_spill]] (!%p2364_p4) }
  0x21   : > { %v793_v1 = vld [vmem:[%s3181_s21 + $0x8] sm:$0xff]  ;;  %v797_v2 = vsel %vm796_vm0, %v792_v0, 0.0 }
  0x22   : > { %798 = vadd.xlane.f32.xlu0 %v797_v2  ;;  %v800_v3 = vsel %vm796_vm0, %v793_v1, 0.0 }
  0x25   : > { %v2365_v21 = vld [vmem:[%s3182_s17] ss:$0 sm:$0xff] }
  0x26   : > { %801 = vadd.xlane.f32.xlu0 %v800_v3  ;;  %v2366_v23 = vld [vmem:[%s3183_s24] ss:$0 sm:$0xff] }
  0xaf   : > { %v799_v4 = vpop.xlane.xlu0 %798 }
  0xb0   : > { %v804_v5 = vmul.f32 0.03125, %v799_v4 }
  0xb2   : > { %v806_v6 = vsub.f32 %v792_v0, %v804_v5 }
  0xb3   : > { %v802_v7 = vpop.xlane.xlu0 %801 }
  0xb4   : > { %v805_v8 = vmul.f32 0.03125, %v802_v7  ;;  %v808_v9 = vmul.f32 %v806_v6, %v806_v6 }
  0xb6   : > { %v807_v10 = vsub.f32 %v793_v1, %v805_v8  ;;  %v810_v11 = vsel %vm796_vm0, %v808_v9, 0.0 }
  0xb7   : > { %811 = vadd.xlane.f32.xlu1 %v810_v11 }
  0xb8   : > { %v809_v12 = vmul.f32 %v807_v10, %v807_v10 }
  0xba   : > { %v813_v13 = vsel %vm796_vm0, %v809_v12, 0.0 }
  0xbb   : > { %814 = vadd.xlane.f32.xlu1 %v813_v13 }
 0x144   : > { %v812_v14 = vpop.xlane.xlu1 %811 }
 0x145   : > { %v816_v15 = vmul.f32 0.03125, %v812_v14 }
 0x147   : > { %v818_v16 = vadd.f32 1e-12, %v816_v15 }
 0x148   : > { %v815_v17 = vpop.xlane.xlu1 %814 }
 0x149   : > { %2654 = vrsqrt.f32 %v818_v16  ;;  %v817_v18 = vmul.f32 0.03125, %v815_v17 }
 0x14b   : > { %v819_v19 = vadd.f32 1e-12, %v817_v18 }
 0x14d   : > { %2656 = vrsqrt.f32 %v819_v19 }
 0x153   : > { %v2655_v20 = vpop.eup %2654 }
 0x154   : > { %v822_v22 = vmul.f32 %v2655_v20, %v806_v6 }
 0x156   : > { %v830_v24 = vmul.f32 %v2365_v21, %v822_v22 }
 0x157   : > { %v2657_v25 = vpop.eup %2656 }
 0x158   : > { %v838_v26 = vadd.f32 %v2366_v23, %v830_v24  ;;  %v823_v27 = vmul.f32 %v2657_v25, %v807_v10 }
 0x15a   : > { %840 = vst.msk [vmem:[#allocation2] sm:$0xff] %vm796_vm0, %v838_v26  ;;  %v831_v28 = vmul.f32 %v2365_v21, %v823_v27 }
 0x15c   : > { %v839_v29 = vadd.f32 %v2366_v23, %v831_v28 }
 0x15e   : > { %841 = vst.msk [vmem:[#allocation2 + $0x8] sm:$0xff] %vm796_vm0, %v839_v29 }
 0x15f PF: > { %v844_v30 = vld [vmem:[%s2865_s4] sm:$0xff]  ;;  %v845_v31 = vld [vmem:[%s2865_s4 + $0x8] sm:$0xff]  ;;  %v846_v32 = vld [vmem:[%s2865_s4 + $0x10] sm:$0xff]  ;;  %vm855_vm1 = vcmask 261120   ;;  %v2726_v38 = vmov 0.0   ;;  %vm2727_vm2 = vmmov 0   ;;  %s3184_s29 = scalar_lea.vmem %s3145_s5, %s2855_s23  ;;  %v1017_v50 = vlaneseq  ;;  %s3186_s27 = scalar_lea.vmem %s3147_s7, %s2855_s23 }
 0x160   : > { %v2576_v33 = vpack.c.bf16 %v845_v31, %v844_v30  ;;  %v847_v34 = vld [vmem:[%s2865_s4 + $0x18] sm:$0xff]  ;;  %2483 = vmatprep.subr.mxu0 %v2726_v38  ;;  %2485 = vmatprep.mubr.msk.f32.mxu0 %vm2727_vm2, %v2726_v38  ;;  %v2367_v39 = vld [vmem:[%s3184_s29] ss:$0 sm:$0xff]  ;;  %s2728_s30 = smov 112   ;;  %s2729_s1 = smov 96   ;;  %vm941_vm3 = vcmask 130048  }
 0x161   : > { %v2934_v35 = vld [vmem:[#allocation2] sm:$0xff]  ;;  %v2580_v36 = vpack.c.bf16 %v847_v34, %v846_v32  ;;  %s2730_s16 = smov 80   ;;  %v1018_v51 = vshrl.u32 %v1017_v50, 7  ;;  %s3185_s17 = sld [smem:[#allocation10_spill]]  ;;  %vm1022_vm4 = vcmask 64512   ;;  %vm1888_vm5 = vcmask 523264  }
 0x162   : > { %2470 = vmatprep.mubr.msk.f32.mxu1 %vm855_vm1, %v2934_v35  ;;  %2577 = vmatprep.subr.bf16.mxu1 %v2576_v33  ;;  %s2731_s19 = smov 64   ;;  %s2732_s25 = smov 48  }
 0x163   : > { %2579 = vmatpush3.bf16.msra.mxu1 %v2576_v33  ;;  %v1019_v52 = vsub.s32 0, %v1018_v51  ;;  %v1362_v59 = vsub.s32 1, %v1018_v51  ;;  %s2733_s24 = smov 16   ;;  %s3188_s6 = scalar_lea.vmem %s3149_s9, %s2855_s23 }
 0x164   : > { %2581 = vmatprep.subr.bf16.mxu1 %v2580_v36  ;;  %p2395_p5 = scmp.ne.s32.totalorder %s2849_s22, 1 }
 0x165   : > { %v2938_v37 = vld [vmem:[#allocation2 + $0x8] sm:$0xff]  ;;  %s3190_s29 = sld [smem:[#allocation13_spill]] (!%p2395_p5)  ;;  %vm2735_vm6 = vmmov (!%p2395_p5), 0   ;;  %vm2025_vm7 = vcmask (!%p2395_p5), 1040384   ;;  %vm2196_vm8 = vcmask (!%p2395_p5), 17408  }
 0x167   : > { %2583 = vmatpush3.bf16.msra.mxu1 %v2580_v36  ;;  %v937_v53 = vld [vmem:[%s3185_s17] sm:$0x3]  ;;  %s3191_s17 = sld [smem:[#allocation15_spill]] (!%p2395_p5) }
 0x168   : > { %2473 = vmatprep.subr.mxu1 %v2726_v38  ;;  %v1020_v54 = vrot.slane %v937_v53, %v1019_v52  ;;  %v1363_v1 = vrot.slane %v937_v53, %v1362_v59  ;;  %v1624_v52 = vld [vmem:[%s2870_s0] sm:$0xff]  ;;  %v1625_v53 = vld [vmem:[%s2870_s0 + $0x8] sm:$0xff] }
 0x16a   : > { %2471 = vmatmul.mubr.msk.f32.vlgmr.msra.gmra.mrb[0].mxu1 %vm855_vm1, %v2938_v37 }
 0x16b   : > { %2475 = vmatprep.mubr.msk.f32.mxu1 %vm2727_vm2, %v2726_v38 }
 0x23d   : > { %v2472_v40 = vpop.f32.mrb[0].mxu1 }
 0x23e   : > { %v928_v41 = vpop.f32.mrb[1].mxu1  ;;  %v2957_v43 = vadd.f32 %v2472_v40, %v2367_v39 }
 0x23f   : > { %v2953_v42 = vadd.f32 %v2367_v39, %v928_v41 }
 0x241   : > { %1110 = vrot.lane.b32.xlu1 %v2953_v42, %s2728_s30  ;;  %939 = vrot.lane.b32.xlu0 %v2953_v42, %s2729_s1 }
 0x245   : > { %1283 = vrot.lane.b32.xlu1 %v2957_v43, %s2729_s1  ;;  %1112 = vrot.lane.b32.xlu0 %v2953_v42, %s2730_s16  ;;  %s3187_s1 = scalar_lea.vmem %s3148_s8, %s2855_s23 }
 0x249   : > { %1452 = vrot.lane.b32.xlu1 %v2957_v43, %s2728_s30  ;;  %1454 = vrot.lane.b32.xlu0 %v2957_v43, %s2730_s16 }
 0x2b3   : > { %v940_v44 = vpop.permute.xlu0 %939  ;;  %v1111_v45 = vpop.permute.xlu1 %1110 }
 0x2b4   : > { %2474 = vmatpush3.xpose.msk.msra.mxu1 %vm941_vm3, %v940_v44 }
 0x2b5   : > { %2478 = vmatprep.subr.mxu1 %v2726_v38 }
 0x2b7   : > { %2476 = vmatmul.mubr.msk.f32.vlgmr.msra.gmra.mrb[2].mxu1 %vm941_vm3, %v2953_v42  ;;  %v1113_v46 = vpop.permute.xlu0 %1112  ;;  %v1284_v47 = vpop.permute.xlu1 %1283 }
 0x2b8   : > { %2484 = vmatpush3.xpose.msk.msra.mxu0 %vm941_vm3, %v1113_v46  ;;  %2480 = vmatprep.mubr.msk.f32.mxu1 %vm2727_vm2, %v2726_v38 }
 0x2b9   : > { %2493 = vmatprep.subr.mxu0 %v2726_v38 }
 0x2bb   : > { %2486 = vmatmul.mubr.msk.f32.vlgmr.msra.gmra.mrb[0].mxu0 %vm941_vm3, %v1111_v45  ;;  %v1455_v48 = vpop.permute.xlu0 %1454  ;;  %v1453_v49 = vpop.permute.xlu1 %1452 }
 0x2bc   : > { %2494 = vmatpush3.xpose.msk.msra.mxu0 %vm941_vm3, %v1284_v47  ;;  %2495 = vmatprep.mubr.msk.f32.mxu0 %vm2727_vm2, %v2726_v38 }
 0x2bd   : > { %2503 = vmatprep.subr.mxu0 %v2726_v38 }
 0x2bf   : > { %2496 = vmatmul.mubr.msk.f32.vlgmr.msra.gmra.mrb[2].mxu0 %vm941_vm3, %v2957_v43 }
 0x2c0   : > { %2504 = vmatpush3.xpose.msk.msra.mxu0 %vm941_vm3, %v1455_v48  ;;  %2505 = vmatprep.mubr.msk.f32.mxu0 %vm2727_vm2, %v2726_v38 }
 0x2c3   : > { %2506 = vmatmul.mubr.msk.f32.vlgmr.msra.gmra.mrb[4].mxu0 %vm941_vm3, %v1453_v49 }
 0x38a   : > { %v1012_v55 = vpop.f32.mrb[2].mxu1 }
 0x38b   : > { %v1016_v56 = vmul.f32 0.25, %v1012_v55  ;;  %v2477_v57 = vpop.f32.mrb[3].mxu1  ;;  %v1626_v55 = vld [vmem:[%s2870_s0 + $0x10] sm:$0xff] }
 0x38d   : > { %v1021_v58 = vadd.f32 %v1020_v54, %v1016_v56  ;;  %v1627_v56 = vld [vmem:[%s2870_s0 + $0x18] sm:$0xff] }
 0x38e   : > { %v1184_v60 = vpop.f32.mrb[0].mxu0  ;;  %v2588_v57 = vpack.c.bf16 %v1627_v56, %v1626_v55  ;;  %v1879_v56 = vld [vmem:[%s2897_s20 + $0x30] sm:$0xff] }
 0x38f   : > { %v1188_v61 = vmul.f32 0.25, %v1184_v60  ;;  %v2487_v62 = vpop.f32.mrb[1].mxu0  ;;  %v1023_v63 = vsel %vm1022_vm4, %v1021_v58, -inf }
 0x390   : > { %1024 = vmax.xlane.f32.xlu0 %v1023_v63 }
 0x391   : > { %v1189_v0 = vadd.f32 %v1188_v61, %v1020_v54  ;;  %v2584_v54 = vpack.c.bf16 %v1625_v53, %v1624_v52  ;;  %v1877_v53 = vld [vmem:[%s2897_s20 + $0x20] sm:$0xff] }
 0x392   : > { %v1355_v2 = vpop.f32.mrb[2].mxu0 }
 0x393   : > { %v1359_v3 = vmul.f32 0.25, %v1355_v2  ;;  %v2497_v4 = vpop.f32.mrb[3].mxu0  ;;  %v1190_v5 = vsel %vm1022_vm4, %v1189_v0, -inf  ;;  %2585 = vmatprep.subr.bf16.mxu0 %v2584_v54 }
 0x394   : > { %1191 = vmax.xlane.f32.xlu1 %v1190_v5  ;;  %2587 = vmatpush3.bf16.msra.mxu0 %v2584_v54  ;;  %v2382_v5 = vld [vmem:[%s3186_s27] ss:$0 sm:$0xff]  ;;  %v1878_v54 = vld [vmem:[%s2897_s20 + $0x28] sm:$0xff]  ;;  %s3192_s27 = sld [smem:[#allocation14_spill]] (!%p2395_p5) }
 0x395   : > { %v1364_v6 = vadd.f32 %v1363_v1, %v1359_v3  ;;  %2589 = vmatprep.subr.bf16.mxu0 %v2588_v57  ;;  %v2608_v55 = vpack.c.bf16 %v1878_v54, %v1877_v53  ;;  %v2027_v53 = vld [vmem:[%s3190_s29] sm:$0xff] (!%p2395_p5)  ;;  %v2028_v54 = vld [vmem:[%s3190_s29 + $0x8] sm:$0xff] (!%p2395_p5) }
 0x396   : > { %v1526_v7 = vpop.f32.mrb[4].mxu0 }
 0x397   : > { %v1530_v8 = vmul.f32 0.25, %v1526_v7  ;;  %v2507_v9 = vpop.f32.mrb[5].mxu0  ;;  %v1365_v10 = vsel %vm1022_vm4, %v1364_v6, -inf }
 0x398   : > { %1366 = vmax.xlane.f32.xlu0 %v1365_v10  ;;  %2591 = vmatpush3.bf16.msra.mxu0 %v2588_v57  ;;  %v1880_v57 = vld [vmem:[%s2897_s20 + $0x38] sm:$0xff] }
 0x399   : > { %v1531_v11 = vadd.f32 %v1530_v8, %v1363_v1 }
 0x39b   : > { %v1532_v12 = vsel %vm1022_vm4, %v1531_v11, -inf }
 0x39c   : > { %1533 = vmax.xlane.f32.xlu0 %v1532_v12 }
 0x3a5   : > { %1034 = vrot.lane.b32.xlu1 %v2953_v42, %s2731_s19 }
 0x41d   : > { %v1025_v13 = vpop.xlane.xlu0 %1024 }
 0x41e   : > { %v1026_v14 = vsub.f32 %v1021_v58, %v1025_v13 }
 0x420   : > { %v1027_v15 = vmul.f32 1.442695, %v1026_v14 }
 0x421   : > { %v1192_v16 = vpop.xlane.xlu1 %1191 }
 0x422   : > { %2658 = vpow2.f32 %v1027_v15  ;;  %v1193_v17 = vsub.f32 %v1189_v0, %v1192_v16 }
 0x424   : > { %v1194_v18 = vmul.f32 1.442695, %v1193_v17 }
 0x425   : > { %v1035_v19 = vpop.permute.xlu1 %1034  ;;  %v1367_v20 = vpop.xlane.xlu0 %1366 }
 0x426   : > { %2660 = vpow2.f32 %v1194_v18  ;;  %v1368_v21 = vsub.f32 %v1364_v6, %v1367_v20  ;;  %2479 = vmatpush3.msra.mxu1 %v1035_v19 }
 0x427   : > { %2488 = vmatprep.subr.mxu1 %v2726_v38 }
 0x428   : > { %v1369_v22 = vmul.f32 1.442695, %v1368_v21 }
 0x429   : > { %v1534_v23 = vpop.xlane.xlu0 %1533 }
 0x42a   : > { %2662 = vpow2.f32 %v1369_v22  ;;  %v1535_v24 = vsub.f32 %v1531_v11, %v1534_v23  ;;  %v1763_v22 = vld [vmem:[%s2887_s28] sm:$0xff]  ;;  %v1764_v23 = vld [vmem:[%s2887_s28 + $0x8] sm:$0xff] }
 0x42c   : > { %v2659_v25 = vpop.eup %2658  ;;  %v1536_v26 = vmul.f32 1.442695, %v1535_v24  ;;  %v2592_v24 = vpack.c.bf16 %v1764_v23, %v1763_v22 }
 0x42d   : > { %v1029_v27 = vsel %vm1022_vm4, %v2659_v25, 0.0 }
 0x42e   : > { %2664 = vpow2.f32 %v1536_v26  ;;  %1030 = vadd.xlane.f32.xlu1 %v1029_v27  ;;  %v1766_v26 = vld [vmem:[%s2887_s28 + $0x18] sm:$0xff] }
 0x430   : > { %v2661_v28 = vpop.eup %2660 }
 0x431   : > { %v1196_v29 = vsel %vm1022_vm4, %v2661_v28, 0.0 }
 0x432   : > { %1197 = vadd.xlane.f32.xlu0 %v1196_v29 }
 0x434   : > { %v2663_v30 = vpop.eup %2662 }
 0x435   : > { %v1371_v31 = vsel %vm1022_vm4, %v2663_v30, 0.0 }
 0x436   : > { %1372 = vadd.xlane.f32.xlu1 %v1371_v31 }
 0x438   : > { %v2665_v32 = vpop.eup %2664 }
 0x439   : > { %v1538_v33 = vsel %vm1022_vm4, %v2665_v32, 0.0 }
 0x43a   : > { %1539 = vadd.xlane.f32.xlu0 %v1538_v33 }
 0x447   : > { %1376 = vrot.lane.b32.xlu1 %v2957_v43, %s2731_s19  ;;  %s3189_s19 = scalar_lea.vmem %s3151_s11, %s2855_s23 }
 0x44b   : > { %1543 = vrot.lane.b32.xlu1 %v2957_v43, %s2732_s25 }
 0x450   : > { %1201 = vrot.lane.b32.xlu0 %v2953_v42, %s2732_s25 }
 0x4bb   : > { %v1031_v34 = vpop.xlane.xlu1 %1030 }
 0x4bc   : > { %2666 = vrcp.f32 %v1031_v34 }
 0x4bf   : > { %v1198_v36 = vpop.xlane.xlu0 %1197 }
 0x4c0   : > { %2668 = vrcp.f32 %v1198_v36  ;;  %v2385_v36 = vld [vmem:[%s3187_s1] ss:$0 sm:$0xff] }
 0x4c3   : > { %v1373_v39 = vpop.xlane.xlu1 %1372 }
 0x4c4   : > { %2670 = vrcp.f32 %v1373_v39 }
 0x4c6   : > { %v2667_v40 = vpop.eup %2666 }
 0x4c7   : > { %v1033_v41 = vmul.f32 %v2667_v40, %v2659_v25  ;;  %v1540_v44 = vpop.xlane.xlu0 %1539  ;;  %v1377_v43 = vpop.permute.xlu1 %1376  ;;  %v1765_v25 = vld [vmem:[%s2887_s28 + $0x10] sm:$0xff]  ;;  %v2386_v40 = vld [vmem:[%s3188_s6] ss:$0 sm:$0xff] }
 0x4c8   : > { %2672 = vrcp.f32 %v1540_v44  ;;  %v2596_v27 = vpack.c.bf16 %v1766_v26, %v1765_v25 }
 0x4c9   : > { %2481 = vmatmul.mubr.msk.f32.vlgmr.msra.gmra.mrb[4].mxu1 %vm1022_vm4, %v1033_v41 }
 0x4ca   : > { %v2669_v45 = vpop.eup %2668  ;;  %2490 = vmatprep.mubr.msk.f32.mxu1 %vm2727_vm2, %v2726_v38 }
 0x4cb   : > { %v1200_v46 = vmul.f32 %v2669_v45, %v2661_v28  ;;  %v1202_v47 = vpop.permute.xlu0 %1201  ;;  %v1544_v49 = vpop.permute.xlu1 %1543 }
 0x4cc   : > { %2489 = vmatpush3.msra.mxu1 %v1202_v47 }
 0x4cd   : > { %2491 = vmatmul.mubr.msk.f32.vlgmr.msra.gmra.mrb[6].mxu1 %vm1022_vm4, %v1200_v46  ;;  %2498 = vmatprep.subr.mxu1 %v2726_v38 }
 0x4ce   : > { %v2671_v42 = vpop.eup %2670  ;;  %2499 = vmatpush3.msra.mxu1 %v1377_v43  ;;  %2500 = vmatprep.mubr.msk.f32.mxu1 %vm2727_vm2, %v2726_v38 }
 0x4cf   : > { %v1375_v48 = vmul.f32 %v2671_v42, %v2663_v30  ;;  %2508 = vmatprep.subr.mxu1 %v2726_v38  ;;  %v1873_v42 = vld [vmem:[%s2897_s20] sm:$0xff] }
 0x4d1   : > { %2501 = vmatmul.mubr.msk.f32.vlgmr.msra.gmra.mrb[8].mxu1 %vm1022_vm4, %v1375_v48  ;;  %v1874_v48 = vld [vmem:[%s2897_s20 + $0x8] sm:$0xff] }
 0x4d2   : > { %v2673_v50 = vpop.eup %2672  ;;  %2509 = vmatpush3.msra.mxu1 %v1544_v49  ;;  %2510 = vmatprep.mubr.msk.f32.mxu1 %vm2727_vm2, %v2726_v38  ;;  %v2600_v49 = vpack.c.bf16 %v1874_v48, %v1873_v42  ;;  %v2394_v42 = vld [vmem:[%s787_s18] ss:$0 sm:$0xff]  ;;  %s3193_s18 = sld [smem:[#allocation16_spill]] (!%p2395_p5) }
 0x4d3   : > { %v1542_v51 = vmul.f32 %v2673_v50, %v2665_v32  ;;  %2593 = vmatprep.subr.bf16.mxu1 %v2592_v24  ;;  %v1875_v50 = vld [vmem:[%s2897_s20 + $0x10] sm:$0xff] }
 0x4d4   : > { %2601 = vmatprep.subr.bf16.mxu0 %v2600_v49 }
 0x4d5   : > { %2511 = vmatmul.mubr.msk.f32.vlgmr.msra.gmra.mrb[10].mxu1 %vm1022_vm4, %v1542_v51  ;;  %v1876_v51 = vld [vmem:[%s2897_s20 + $0x18] sm:$0xff] }
 0x4d6   : > { %2595 = vmatpush3.bf16.msra.mxu1 %v2592_v24  ;;  %v2604_v52 = vpack.c.bf16 %v1876_v51, %v1875_v50 }
 0x4d7   : > { %2597 = vmatprep.subr.bf16.mxu1 %v2596_v27 }
 0x4da   : > { %2599 = vmatpush3.bf16.msra.mxu1 %v2596_v27 }
 0x59c   : > { %v1106_v58 = vpop.f32.mrb[4].mxu1 }
 0x59d   : > { %v2482_v59 = vpop.f32.mrb[5].mxu1 }
 0x59e   : > { %v2387_v59 = vld [vmem:[%s3189_s19] ss:$0 sm:$0xff] }
 0x5a0   : > { %v1273_v60 = vpop.f32.mrb[6].mxu1 }
 0x5a1   : > { %1278 = vrot.lane.b32.xlu0 %v1273_v60, %s2733_s24  ;;  %v2492_v38 = vpop.f32.mrb[7].mxu1 }
 0x5a4   : > { %v1448_v61 = vpop.f32.mrb[8].mxu1 }
 0x5a5   : > { %v2502_v62 = vpop.f32.mrb[9].mxu1 }
 0x5a8   : > { %v1615_v63 = vpop.f32.mrb[10].mxu1 }
 0x5a9   : > { %1620 = vrot.lane.b32.xlu1 %v1615_v63, %s2733_s24  ;;  %v2512_v0 = vpop.f32.mrb[11].mxu1 }
 0x613   : > { %v1279_v1 = vpop.permute.xlu0 %1278 }
 0x614   : > { %v1281_v2 = vsel %vm941_vm3, %v1106_v58, %v1279_v1  ;;  %v2612_v58 = vpack.c.bf16 %v1880_v57, %v1879_v56  ;;  %v2734_v56 = vmov (!%p2395_p5), 0.0|0.0   ;;  %v2617_v57 = vpack.c.bf16 (!%p2395_p5), %v2028_v54, %v2027_v53 }
 0x615   : > { %2521 = vmatprep.mubr.msk.f32.mxu0 %vm855_vm1, %v1281_v2  ;;  %2622 = vmatprep.subr.bf16.mxu1 (!%p2395_p5), %v2734_v56 }
 0x61b   : > { %v1621_v3 = vpop.permute.xlu1 %1620 }
 0x61c   : > { %v1623_v4 = vsel %vm941_vm3, %v1448_v61, %v1621_v3 }
 0x61d   : > { %2522 = vmatmul.mubr.msk.f32.vlgmr.msra.gmra.mrb[6].mxu0 %vm855_vm1, %v1623_v4 }
 0x61e   : > { %2603 = vmatpush3.bf16.msra.mxu0 %v2600_v49 }
 0x61f   : > { %2605 = vmatprep.subr.bf16.mxu0 %v2604_v52 }
 0x622   : > { %2607 = vmatpush3.bf16.msra.mxu0 %v2604_v52 }
 0x623   : > { %2609 = vmatprep.subr.bf16.mxu0 %v2608_v55 }
 0x626   : > { %2611 = vmatpush3.bf16.msra.mxu0 %v2608_v55  ;;  %v2029_v55 = vld [vmem:[%s3190_s29 + $0x10] sm:$0xff] (!%p2395_p5) }
 0x627   : > { %2613 = vmatprep.subr.bf16.mxu0 %v2612_v58 }
 0x62a   : > { %2615 = vmatpush3.bf16.msra.mxu0 %v2612_v58  ;;  %v2030_v58 = vld [vmem:[%s3190_s29 + $0x18] sm:$0xff] (!%p2395_p5) }
 0x62b   : > { %2616 = vmatprep.subr.bf16.mxu0 (!%p2395_p5), %v2734_v56 }
 0x6f0   : > { %v2523_v6 = vpop.f32.mrb[6].mxu0 }
 0x6f1   : > { %v1713_v7 = vadd.f32 %v2523_v6, %v2382_v5  ;;  %v1707_v8 = vpop.f32.mrb[7].mxu0 }
 0x6f2   : > { %v1708_v9 = vadd.f32 %v2382_v5, %v1707_v8 }
 0x6f3   : > { %v1717_v10 = vadd.f32 %v1713_v7, %v2938_v37 }
 0x6f4   : > { %v1716_v11 = vadd.f32 %v1708_v9, %v2934_v35 }
 0x6f5   : > { %v1723_v12 = vsel %vm855_vm1, %v1717_v10, 0.0 }
 0x6f6   : > { %1724 = vadd.xlane.f32.xlu1 %v1723_v12  ;;  %v1720_v13 = vsel %vm855_vm1, %v1716_v11, 0.0 }
 0x6f7   : > { %1721 = vadd.xlane.f32.xlu0 %v1720_v13 }
 0x783   : > { %v1725_v14 = vpop.xlane.xlu1 %1724 }
 0x784   : > { %v1728_v15 = vmul.f32 0.03125, %v1725_v14  ;;  %v1722_v16 = vpop.xlane.xlu0 %1721 }
 0x785   : > { %v1727_v17 = vmul.f32 0.03125, %v1722_v16 }
 0x786   : > { %v1730_v18 = vsub.f32 %v1717_v10, %v1728_v15 }
 0x787   : > { %v1729_v19 = vsub.f32 %v1716_v11, %v1727_v17  ;;  %v2390_v17 = vld [vmem:[%s781_s2] ss:$0 sm:$0xff] }
 0x788   : > { %v1732_v35 = vmul.f32 %v1730_v18, %v1730_v18 }
 0x789   : > { %v1731_v20 = vmul.f32 %v1729_v19, %v1729_v19 }
 0x78a   : > { %v1736_v21 = vsel %vm855_vm1, %v1732_v35, 0.0 }
 0x78b   : > { %v1733_v37 = vsel %vm855_vm1, %v1731_v20, 0.0 }
 0x78c   : > { %1734 = vadd.xlane.f32.xlu0 %v1733_v37 }
 0x790   : > { %1737 = vadd.xlane.f32.xlu0 %v1736_v21 }
 0x819   : > { %v1735_v28 = vpop.xlane.xlu0 %1734 }
 0x81a   : > { %v1739_v29 = vmul.f32 0.03125, %v1735_v28 }
 0x81c   : > { %v1741_v30 = vadd.f32 1e-12, %v1739_v29 }
 0x81d   : > { %v1738_v31 = vpop.xlane.xlu0 %1737 }
 0x81e   : > { %2674 = vrsqrt.f32 %v1741_v30  ;;  %v1740_v32 = vmul.f32 0.03125, %v1738_v31 }
 0x820   : > { %v1742_v33 = vadd.f32 1e-12, %v1740_v32 }
 0x822   : > { %2676 = vrsqrt.f32 %v1742_v33 }
 0x828   : > { %v2675_v34 = vpop.eup %2674 }
 0x829   : > { %v1745_v39 = vmul.f32 %v2675_v34, %v1729_v19 }
 0x82b   : > { %v1753_v41 = vmul.f32 %v2385_v36, %v1745_v39 }
 0x82c   : > { %v2677_v44 = vpop.eup %2676 }
 0x82d   : > { %v1746_v45 = vmul.f32 %v2677_v44, %v1730_v18  ;;  %v1761_v46 = vadd.f32 %v2386_v40, %v1753_v41 }
 0x82f   : > { %v1754_v43 = vmul.f32 %v2385_v36, %v1746_v45  ;;  %2532 = vmatprep.mubr.msk.f32.mxu1 %vm855_vm1, %v1761_v46 }
 0x831   : > { %v1762_v47 = vadd.f32 %v2386_v40, %v1754_v43 }
 0x833   : > { %2533 = vmatmul.mubr.msk.f32.vlgmr.msra.gmra.mrb[12].mxu1 %vm855_vm1, %v1762_v47 }
 0x906   : > { %v2534_v60 = vpop.f32.mrb[12].mxu1 }
 0x907   : > { %v1852_v38 = vadd.f32 %v2534_v60, %v2387_v59  ;;  %v1846_v61 = vpop.f32.mrb[13].mxu1  ;;  %v2620_v60 = vpack.c.bf16 (!%p2395_p5), %v2030_v58, %v2029_v55 }
 0x908   : > { %v1847_v62 = vadd.f32 %v2387_v59, %v1846_v61  ;;  %v2736_v59 = vmov (!%p2395_p5), 0.0  }
 0x909   : > { %v1858_v63 = vmul.f32 0.044715, %v1852_v38  ;;  %v1856_v14 = vmul.f32 0.5, %v1852_v38  ;;  %2573 = vmatprep.mubr.msk.f32.mxu1 (!%p2395_p5), %vm2735_vm6, %v2736_v59 }
 0x90a   : > { %v1857_v0 = vmul.f32 0.044715, %v1847_v62  ;;  %v1855_v12 = vmul.f32 0.5, %v1847_v62 }
 0x90b   : > { %v1860_v1 = vmul.f32 %v1858_v63, %v1852_v38  ;;  %v2113_v63 = vld [vmem:[%s3191_s17 + $0x8] sm:$0xff] (!%p2395_p5) }
 0x90c   : > { %v1859_v2 = vmul.f32 %v1857_v0, %v1847_v62  ;;  %v2114_v0 = vld [vmem:[%s3191_s17 + $0x10] sm:$0xff] (!%p2395_p5) }
 0x90d   : > { %v1862_v3 = vmul.f32 %v1860_v1, %v1852_v38 }
 0x90e   : > { %v1861_v4 = vmul.f32 %v1859_v2, %v1847_v62  ;;  %v2115_v2 = vld [vmem:[%s3191_s17 + $0x18] sm:$0xff] (!%p2395_p5) }
 0x90f   : > { %v1864_v5 = vadd.f32 %v1862_v3, %v1852_v38  ;;  %v2626_v3 = vpack.c.bf16 (!%p2395_p5), %v2115_v2, %v2114_v0 }
 0x910   : > { %v1863_v6 = vadd.f32 %v1861_v4, %v1847_v62  ;;  %v2112_v62 = vld [vmem:[%s3191_s17] sm:$0xff] (!%p2395_p5) }
 0x911   : > { %v1866_v7 = vmul.f32 0.7978846, %v1864_v5  ;;  %v2623_v1 = vpack.c.bf16 (!%p2395_p5), %v2113_v63, %v2112_v62  ;;  %v2396_v4 = vld [vmem:[%s3192_s27] ss:$0 sm:$0xff] (!%p2395_p5) }
 0x912   : > { %v1865_v8 = vmul.f32 0.7978846, %v1863_v6 }
 0x913   : > { %2678 = vtanh.f32 %v1866_v7  ;;  %2624 = vmatpush3.bf16.msra.mxu1 (!%p2395_p5), %v2623_v1 }
 0x914   : > { %2680 = vtanh.f32 %v1865_v8  ;;  %2625 = vmatprep.subr.bf16.mxu1 (!%p2395_p5), %v2734_v56 }
 0x917   : > { %2627 = vmatpush3.bf16.msra.mxu1 (!%p2395_p5), %v2626_v3 }
 0x91d   : > { %v2679_v9 = vpop.eup %2678 }
 0x91e   : > { %v2681_v10 = vpop.eup %2680  ;;  %v1870_v11 = vadd.f32 1.0, %v2679_v9  ;;  %v2398_v9 = vld [vmem:[%s3193_s18] ss:$0 sm:$0xff] (!%p2395_p5) }
 0x91f   : > { %v1869_v13 = vadd.f32 1.0, %v2681_v10 }
 0x920   : > { %v1872_v16 = vmul.f32 %v1870_v11, %v1856_v14 }
 0x921   : > { %v1871_v15 = vmul.f32 %v1869_v13, %v1855_v12 }
 0x923   : > { %2551 = vmatprep.mubr.msk.f32.mxu0 %vm1888_vm5, %v1871_v15 }
 0x924   : > { %2552 = vmatmul.mubr.msk.f32.vlgmr.msra.gmra.mrb[8].mxu0 %vm1888_vm5, %v1872_v16 }
 0x925   : > { %2562 = vmatprep.mubr.msk.f32.mxu0 (!%p2395_p5), %vm2735_vm6, %v2736_v59  ;;  %2618 = vmatpush3.bf16.msra.mxu0 (!%p2395_p5), %v2617_v57 }
 0x926   : > { %2619 = vmatprep.subr.bf16.mxu0 (!%p2395_p5), %v2734_v56 }
 0x929   : > { %2621 = vmatpush3.bf16.msra.mxu0 (!%p2395_p5), %v2620_v60 }
 0x9f7   : > { %v2553_v18 = vpop.f32.mrb[8].mxu0 }
 0x9f8   : > { %v1967_v19 = vadd.f32 %v2553_v18, %v2390_v17  ;;  %v1961_v20 = vpop.f32.mrb[9].mxu0 }
 0x9f9   : > { %v1962_v37 = vadd.f32 %v2390_v17, %v1961_v20 }
 0x9fa   : > { %v1971_v35 = vadd.f32 %v1967_v19, %v1762_v47 }
 0x9fb   : > { %v1970_v21 = vadd.f32 %v1962_v37, %v1761_v46  ;;  %v2393_v46 = vld [vmem:[%s784_s26] ss:$0 sm:$0xff] }
 0x9fc   : > { %v1977_v22 = vsel %vm855_vm1, %v1971_v35, 0.0 }
 0x9fd   : > { %1978 = vadd.xlane.f32.xlu0 %v1977_v22  ;;  %v1974_v23 = vsel %vm855_vm1, %v1970_v21, 0.0 }
 0x9fe   : > { %1975 = vadd.xlane.f32.xlu1 %v1974_v23 }
 0xa8a   : > { %v1979_v24 = vpop.xlane.xlu0 %1978 }
 0xa8b   : > { %v1981_v25 = vmul.f32 0.03125, %v1979_v24  ;;  %v1976_v26 = vpop.xlane.xlu1 %1975 }
 0xa8c   : > { %v1980_v27 = vmul.f32 0.03125, %v1976_v26 }
 0xa8d   : > { %v1983_v28 = vsub.f32 %v1971_v35, %v1981_v25 }
 0xa8e   : > { %v1982_v29 = vsub.f32 %v1970_v21, %v1980_v27 }
 0xa8f   : > { %v1985_v30 = vmul.f32 %v1983_v28, %v1983_v28 }
 0xa90   : > { %v1984_v31 = vmul.f32 %v1982_v29, %v1982_v29 }
 0xa91   : > { %v1989_v32 = vsel %vm855_vm1, %v1985_v30, 0.0 }
 0xa92   : > { %1990 = vadd.xlane.f32.xlu0 %v1989_v32  ;;  %v1986_v33 = vsel %vm855_vm1, %v1984_v31, 0.0 }
 0xa93   : > { %1987 = vadd.xlane.f32.xlu1 %v1986_v33 }
 0xb1f   : > { %v1991_v34 = vpop.xlane.xlu0 %1990 }
 0xb20   : > { %v1993_v36 = vmul.f32 0.03125, %v1991_v34  ;;  %v1988_v39 = vpop.xlane.xlu1 %1987 }
 0xb21   : > { %v1992_v40 = vmul.f32 0.03125, %v1988_v39 }
 0xb22   : > { %v1995_v41 = vadd.f32 1e-12, %v1993_v36 }
 0xb23   : > { %v1994_v44 = vadd.f32 1e-12, %v1992_v40 }
 0xb24   : > { %2682 = vrsqrt.f32 %v1995_v41 }
 0xb25   : > { %2684 = vrsqrt.f32 %v1994_v44 }
 0xb2e   : > { %v2683_v45 = vpop.eup %2682 }
 0xb2f   : > { %v2685_v43 = vpop.eup %2684  ;;  %v1999_v47 = vmul.f32 %v2683_v45, %v1983_v28 }
 0xb30   : > { %v1998_v48 = vmul.f32 %v2685_v43, %v1982_v29  ;;  %2021 = sbr.rel (%p2395_p5) target bundleno = 3312 (0xcf0), region = 108 }
 0xb31   : > { %v2007_v49 = vmul.f32 %v2393_v46, %v1999_v47 }
 0xb32   : > { %v2006_v50 = vmul.f32 %v2393_v46, %v1998_v48 }
 0xb33   : > { %v2015_v51 = vadd.f32 %v2394_v42, %v2007_v49 }
 0xb34   : > { %v2014_v52 = vadd.f32 %v2394_v42, %v2006_v50 }
 0xb35   : > { %2017 = vst.msk [vmem:[#allocation2 + $0x8] sm:$0xff] %vm855_vm1, %v2015_v51  ;;  %v2023_v38 = vrot.slane (!%p2395_p5), %v2015_v51, 7 }
 0xb36   : > { %2016 = vst.msk [vmem:[#allocation2] sm:$0xff] %vm855_vm1, %v2014_v52 }
 0xb37   : > { %v2026_v61 = vsel %vm2025_vm7, %v2014_v52, %v2023_v38 }
 0xb38   : > { %2563 = vmatmul.mubr.msk.f32.vlgmr.msra.gmra.mrb[0].mxu0 %vm855_vm1, %v2026_v61 }
 0xc0b   : > { %v2107_v5 = vpop.f32.mrb[0].mxu0 }
 0xc0c   : > { %v2108_v6 = vadd.f32 %v2396_v4, %v2107_v5  ;;  %v2564_v7 = vpop.f32.mrb[1].mxu0 }
 0xc0e   : > { %2686 = vtanh.f32 %v2108_v6 }
 0xc18   : > { %v2687_v8 = vpop.eup %2686 }
 0xc19   : > { %2574 = vmatmul.mubr.msk.f32.vlgmr.msra.gmra.mrb[0].mxu1 %vm855_vm1, %v2687_v8 }
 0xcec   : > { %v2192_v10 = vpop.f32.mrb[0].mxu1 }
 0xced   : > { %v2193_v11 = vadd.f32 %v2398_v9, %v2192_v10  ;;  %v2575_v12 = vpop.f32.mrb[1].mxu1 }
 0xcef   : > { %2197 = vst.msk [vmem:[#allocation3] sm:$0x3] %vm2196_vm8, %v2193_v11 }
 0xcf0 PF: > { %p2632_p6 = scmp.eq.s32.totalorder %s2849_s22, 1  ;;  %s2737_s23 = smov [#allocation3]  }
 0xcf1   : > { %s2205_s28 = sshll.u32 %s2737_s23, 4  ;;  %s2206_s28 = int_to_ptr.vmem [resolvable:$true] %s2205_s28 }
 0xcf2   : > { %s2688_s16 = scalar_lea.vmem %s2206_s28, 32  ;;  %p2695_p10 = scmp.lt.s32.totalorder %s2206_s28, %s2206_s28 }
 0xcf3   : > { %p2689_p7 = scmp.ne.s32.totalorder %s2206_s28, %s2688_s16  ;;  %p2696_p11 = scmp.lt.s32.totalorder %s2688_s16, %s2688_s16 }
 0xcf5   : > { %p2690_p8 = pnand %p2689_p7, %p2632_p6  ;;  %p2697_p12 = por %p2696_p11, %p2695_p10 }
 0xcf7   : > { %p2691_p9 = pneg %p2690_p8 }
 0xcf9   : > { %p2698_p13 = pnand %p2697_p12, %p2691_p9 }
 0xcfb   : > { %2701 = shalt.err (!%p2698_p13)
}
 0xcfc   : > { %s3194_s19 = sld [smem:[#allocation17_spill]] }
 0xd02   : > { %s2702_s20 = scalar_lea.hbm %s3194_s19, 32 }
 0xd03   : > { %p2703_p0 = scmp.ne.s32.totalorder %s3194_s19, %s2702_s20  ;;  %p2708_p3 = scmp.lt.u32.totalorder %s2702_s20, %s3194_s19 }
 0xd05   : > { %p2704_p1 = pnand %p2703_p0, %p2632_p6 }
 0xd07   : > { %p2705_p2 = pneg %p2704_p1 }
 0xd09   : > { %p2710_p4 = pnand %p2708_p3, %p2705_p2 }
 0xd0b   : > { %2713 = shalt.err (!%p2710_p4)
}
 0xd0c   : > { %2629 = dma.vmem_to_hbm [thread:$0]  (%p2632_p6), %s2206_s28, 32, %s3194_s19, [#allocation4]  }
 0xd0d   : > { %2719 = dma.done.wait (%p2632_p6), [#allocation4], 32  }
 0xd0e   : > { %2721 = vsyncadd (%p2632_p6), [#allocation4], 4294967264 }
 0xd0f PF: > { %s3195_s27 = sld [smem:[#allocation6_spill]] }
 0xd15   : > { %s31_s1 = sadd.s32 1, %s3195_s27  }
 0xd16   : > { %p28_p5 = scmp.ge.s32.totalorder %s31_s1, 4  }
 0xd18   :  { %30 = sbr.rel (!%p28_p5) target bundleno = 13 (0xd), region = 168 }
 0xd1f   :  { %2218 = vsyncpa [#allocation4], 1 }
 0xd20   :  { %2220 = vsyncpa [#allocation4 + $0x1], 1 }

</bundles_post_ra>
